<compile_context>
chip_gen: v7x
topology: tpu7x:2x2x1
jax: 0.10.0
libtpu: 0.0.40
codegen_flags: <defaults>
</compile_context>

<pallas_src>
import functools
import math

import jax
import jax.numpy as jnp
from jax.experimental import pallas as pl
from jax.experimental.pallas import tpu as pltpu

# ----- small config consistent with the module's forward ---------------------
PATCH_DIM = 64
EMBED_DIM = 32
NUM_HEADS = 4
MLP_DIM = 64
NUM_LAYERS = 2
NUM_CLASSES = 10
NUM_PATCHES = 4                  # image patches; sequence length = patches + cls
SEQ_LEN = NUM_PATCHES + 1
HEAD_DIM = EMBED_DIM // NUM_HEADS
LN_EPS = 1e-5                    # torch.nn.LayerNorm default
LANE = 128                       # lane width of the packed slabs / padded head
NEG_MASK = -1e30                 # additive mask value for cross-batch attention

# ----- packed-slab row layout (shared by pack_params and the kernel) ---------
# weight slab: rows 0:64 pe_w | per layer [wqkv(32), wo(32), w1(32), w2(64)] | head_w(32)
ROWS_PER_LAYER = EMBED_DIM + EMBED_DIM + EMBED_DIM + MLP_DIM        # 160 (8-aligned)
W_LAYER0 = PATCH_DIM                                                # 64
W_HEAD = PATCH_DIM + NUM_LAYERS * ROWS_PER_LAYER                    # 384
W_ROWS = W_HEAD + EMBED_DIM                                         # 416
# vector slab: cls_row | posb(NUM_PATCHES) | per layer 8 rows | head_b
V_CLS = 0
V_POSB = 1
V_LAYER0 = V_POSB + NUM_PATCHES
V_PER_LAYER = 8                  # ln1_g, ln1_b, bqkv, bo, ln2_g, ln2_b, b1, b2
V_HEADB = V_LAYER0 + NUM_LAYERS * V_PER_LAYER
V_ROWS = V_HEADB + 1             # 22


# ----------------------------- shared math -----------------------------------
def _layer_norm(x, g, b):
    mu = jnp.mean(x, axis=-1, keepdims=True)
    var = jnp.mean((x - mu) ** 2, axis=-1, keepdims=True)   # biased, like PyTorch
    return (x - mu) * jax.lax.rsqrt(var + LN_EPS) * g + b


def _erf_approx(x):
    # Abramowitz & Stegun 7.1.26, |err| < 1.5e-7 (~f32 eps); stands in for the
    # exact erf that torch.nn.GELU() uses (no erf primitive lowering in Mosaic).
    a1, a2, a3, a4, a5 = 0.254829592, -0.284496736, 1.421413741, -1.453152027, 1.061405429
    p = 0.3275911
    s = jnp.where(x >= 0.0, 1.0, -1.0)
    z = jnp.abs(x)
    t = 1.0 / (1.0 + p * z)
    poly = ((((a5 * t + a4) * t + a3) * t + a2) * t + a1) * t
    return s * (1.0 - poly * jnp.exp(-z * z))


def _gelu_exact(x):
    return 0.5 * x * (1.0 + _erf_approx(x * (1.0 / math.sqrt(2.0))))


# ----------------------- single fused forward kernel -------------------------
def vit_fused_kernel(x_ref, w_ref, v_ref, o_ref, *, batch):
    # x_ref: (B*NUM_PATCHES, PATCH_DIM) patch slab
    # w_ref: (W_ROWS, 128)  packed matmul weights (zero-padded lanes/rows)
    # v_ref: (V_ROWS, 128)  packed LN params / biases / pos rows / cls row
    # o_ref: (B, 128)       padded logits (cols >= NUM_CLASSES are zero)
    bn = batch * SEQ_LEN
    inv_sqrt_hd = 1.0 / math.sqrt(HEAD_DIM)        # dot_product_norm=True

    vec = v_ref[...]                                # whole vector slab, read once

    # ---- patch embed + pos embed; assemble [cls, patches] per batch on-chip --
    pe_w = w_ref[0:PATCH_DIM, :]                    # (64, 128), cols >= 32 zero
    pemb = jnp.dot(x_ref[...], pe_w,
                   preferred_element_type=jnp.float32)[:, :EMBED_DIM]
    posb = vec[V_POSB:V_POSB + NUM_PATCHES, :EMBED_DIM]     # pe_b + pos[1:]
    cls_row = vec[V_CLS:V_CLS + 1, :EMBED_DIM]               # cls@pe_w + pe_b + pos[0]
    pieces = []
    for b in range(batch):
        pieces.append(cls_row)
        pieces.append(pemb[b * NUM_PATCHES:(b + 1) * NUM_PATCHES, :] + posb)
    z = jnp.concatenate(pieces, axis=0)                       # (bn, 32)

    # ---- block-diagonal additive attention mask, built on-chip (no HBM buf) --
    ri = jax.lax.broadcasted_iota(jnp.int32, (bn, bn), 0)
    ci = jax.lax.broadcasted_iota(jnp.int32, (bn, bn), 1)
    rb = jnp.zeros((bn, bn), jnp.int32)
    cb = jnp.zeros((bn, bn), jnp.int32)
    for b in range(1, batch):                      # batch-id without integer div
        thr = b * SEQ_LEN
        rb = rb + jnp.where(ri >= thr, 1, 0)
        cb = cb + jnp.where(ci >= thr, 1, 0)
    mask = jnp.where(rb == cb, 0.0, NEG_MASK).astype(jnp.float32)

    # ---- transformer encoder layers (unrolled; weights sliced from the slab) -
    for li in range(NUM_LAYERS):
        wb = W_LAYER0 + li * ROWS_PER_LAYER        # 8-aligned row offsets
        vb = V_LAYER0 + li * V_PER_LAYER
        ln1g = vec[vb + 0:vb + 1, :EMBED_DIM]
        ln1b = vec[vb + 1:vb + 2, :EMBED_DIM]
        bqkv = vec[vb + 2:vb + 3, :3 * EMBED_DIM]
        bo = vec[vb + 3:vb + 4, :EMBED_DIM]
        ln2g = vec[vb + 4:vb + 5, :EMBED_DIM]
        ln2b = vec[vb + 5:vb + 6, :EMBED_DIM]
        b1 = vec[vb + 6:vb + 7, :MLP_DIM]
        b2 = vec[vb + 7:vb + 8, :EMBED_DIM]

        wqkv = w_ref[wb:wb + EMBED_DIM, :]                                     # (32,128)
        wo = w_ref[wb + EMBED_DIM:wb + 2 * EMBED_DIM, :]                       # (32,128)
        w1 = w_ref[wb + 2 * EMBED_DIM:wb + 3 * EMBED_DIM, :]                   # (32,128)
        w2 = w_ref[wb + 3 * EMBED_DIM:wb + 3 * EMBED_DIM + MLP_DIM, :]         # (64,128)

        # pre-norm multi-head self-attention (batched via block-diagonal mask)
        h = _layer_norm(z, ln1g, ln1b)
        qkv = jnp.dot(h, wqkv,
                      preferred_element_type=jnp.float32)[:, :3 * EMBED_DIM] + bqkv
        q = qkv[:, 0:EMBED_DIM] * inv_sqrt_hd
        k = qkv[:, EMBED_DIM:2 * EMBED_DIM]
        v = qkv[:, 2 * EMBED_DIM:3 * EMBED_DIM]

        ctxs = []
        for hi in range(NUM_HEADS):
            sl = slice(hi * HEAD_DIM, (hi + 1) * HEAD_DIM)
            s = jax.lax.dot_general(q[:, sl], k[:, sl], (((1,), (1,)), ((), ())),
                                    preferred_element_type=jnp.float32)
            s = s + mask
            s = s - jnp.max(s, axis=-1, keepdims=True)         # stable softmax
            p = jnp.exp(s)
            p = p * pl.reciprocal(jnp.sum(p, axis=-1, keepdims=True), approx=True)
            ctxs.append(jnp.dot(p, v[:, sl], preferred_element_type=jnp.float32))
        ctx = jnp.concatenate(ctxs, axis=-1)                   # (bn, 32): one wo push
        attn = jnp.dot(ctx, wo,
                       preferred_element_type=jnp.float32)[:, :EMBED_DIM] + bo
        z = z + attn                                           # residual (dropout p=0)

        # pre-norm MLP
        h2 = _layer_norm(z, ln2g, ln2b)
        m = jnp.dot(h2, w1, preferred_element_type=jnp.float32)[:, :MLP_DIM] + b1
        m = _gelu_exact(m)                                     # nn.GELU() (exact erf)
        z = z + jnp.dot(m, w2,
                        preferred_element_type=jnp.float32)[:, :EMBED_DIM] + b2

    # ---- classification head on the cls rows only (lane-dense padded out) ----
    zcls = jnp.concatenate([z[b * SEQ_LEN:b * SEQ_LEN + 1, :] for b in range(batch)],
                           axis=0)                             # (B, 32)
    head_w = w_ref[W_HEAD:W_HEAD + EMBED_DIM, :]               # (32,128), cols>=10 zero
    head_b = vec[V_HEADB:V_HEADB + 1, :]
    o_ref[...] = jnp.dot(zcls, head_w, preferred_element_type=jnp.float32) + head_b


# ----------------------- one-time parameter packing --------------------------
def pack_params(p):
    """Pack all parameters into two lane-dense f32 slabs. Runs ONCE at init."""
    w = jnp.zeros((W_ROWS, LANE), jnp.float32)
    w = w.at[0:PATCH_DIM, :EMBED_DIM].set(p['pe_w'])
    for li, lp in enumerate(p['layers']):
        wb = W_LAYER0 + li * ROWS_PER_LAYER
        wqkv = jnp.concatenate([lp['wq'], lp['wk'], lp['wv']], axis=1)
        w = w.at[wb:wb + EMBED_DIM, :3 * EMBED_DIM].set(wqkv)
        w = w.at[wb + EMBED_DIM:wb + 2 * EMBED_DIM, :EMBED_DIM].set(lp['wo'])
        w = w.at[wb + 2 * EMBED_DIM:wb + 3 * EMBED_DIM, :MLP_DIM].set(lp['w1'])
        w = w.at[wb + 3 * EMBED_DIM:wb + 3 * EMBED_DIM + MLP_DIM, :EMBED_DIM].set(lp['w2'])
    w = w.at[W_HEAD:W_HEAD + EMBED_DIM, :NUM_CLASSES].set(p['head_w'])

    v = jnp.zeros((V_ROWS, LANE), jnp.float32)
    # cls row of the embedded sequence is parameter-only: precompute it here
    cls_row = p['cls_token'].reshape(1, PATCH_DIM) @ p['pe_w'] + p['pe_b'] + p['pos'][0:1]
    v = v.at[V_CLS, :EMBED_DIM].set(cls_row[0])
    v = v.at[V_POSB:V_POSB + NUM_PATCHES, :EMBED_DIM].set(p['pe_b'] + p['pos'][1:])
    for li, lp in enumerate(p['layers']):
        vb = V_LAYER0 + li * V_PER_LAYER
        bqkv = jnp.concatenate([lp['bq'], lp['bk'], lp['bv']], axis=1)
        v = v.at[vb + 0, :EMBED_DIM].set(lp['ln1_g'][0])
        v = v.at[vb + 1, :EMBED_DIM].set(lp['ln1_b'][0])
        v = v.at[vb + 2, :3 * EMBED_DIM].set(bqkv[0])
        v = v.at[vb + 3, :EMBED_DIM].set(lp['bo'][0])
        v = v.at[vb + 4, :EMBED_DIM].set(lp['ln2_g'][0])
        v = v.at[vb + 5, :EMBED_DIM].set(lp['ln2_b'][0])
        v = v.at[vb + 6, :MLP_DIM].set(lp['b1'][0])
        v = v.at[vb + 7, :EMBED_DIM].set(lp['b2'][0])
    v = v.at[V_HEADB, :NUM_CLASSES].set(p['head_b'][0])
    return w, v


# ----------------------------- full forward ----------------------------------
@jax.jit
def vit_forward(x, w_slab, v_slab):
    B = x.shape[0]
    x2 = x.reshape(B * NUM_PATCHES, PATCH_DIM)     # contiguous merge: free bitcast
    kernel = functools.partial(vit_fused_kernel, batch=B)
    # Grid-less single invocation: total live data ~225 KiB, fits VMEM on
    # v5e/v6e (128 MiB) and v7x (64 MiB) with huge margin.
    # TODO(synk): for large B on v7x, add a batch grid with
    # dimension_semantics=("parallel",) to use both TensorCores.
    out = pl.pallas_call(
        kernel,
        out_shape=jax.ShapeDtypeStruct((B, LANE), jnp.float32),
        in_specs=[pl.BlockSpec(memory_space=pltpu.MemorySpace.VMEM)] * 3,
        out_specs=pl.BlockSpec(memory_space=pltpu.MemorySpace.VMEM),
    )(x2, w_slab, v_slab)
    return out[:, :NUM_CLASSES]                    # real class columns only


# ----------------------------- pure-JAX reference ----------------------------
def reference_forward(x, p):
    B = x.shape[0]
    cls = jnp.broadcast_to(p['cls_token'], (B, 1, PATCH_DIM))
    z = jnp.concatenate([cls, x], axis=1)
    z = z @ p['pe_w'] + p['pe_b'] + p['pos']
    for w in p['layers']:
        h = _layer_norm(z, w['ln1_g'], w['ln1_b'])
        q = h @ w['wq'] + w['bq']
        k = h @ w['wk'] + w['bk']
        v = h @ w['wv'] + w['bv']
        def split(t):
            return t.reshape(B, SEQ_LEN, NUM_HEADS, HEAD_DIM).transpose(0, 2, 1, 3)
        qh, kh, vh = split(q), split(k), split(v)
        s = jnp.einsum('bhnd,bhmd->bhnm', qh, kh) / math.sqrt(HEAD_DIM)
        a = jax.nn.softmax(s, axis=-1)
        att = jnp.einsum('bhnm,bhmd->bhnd', a, vh)
        att = att.transpose(0, 2, 1, 3).reshape(B, SEQ_LEN, EMBED_DIM)
        z = z + att @ w['wo'] + w['bo']
        h2 = _layer_norm(z, w['ln2_g'], w['ln2_b'])
        m = jax.nn.gelu(h2 @ w['w1'] + w['b1'], approximate=False)
        z = z + m @ w['w2'] + w['b2']
    return z[:, 0] @ p['head_w'] + p['head_b']


# ----------------------------- deterministic params --------------------------
def init_params(key):
    keys = iter(jax.random.split(key, 64))

    def nrm(shape, std):
        return (std * jax.random.normal(next(keys), shape)).astype(jnp.float32)

    params = {
        'cls_token': nrm((1, 1, PATCH_DIM), 0.02),
        'pe_w': nrm((PATCH_DIM, EMBED_DIM), 0.05),
        'pe_b': nrm((1, EMBED_DIM), 0.02),
        'pos': nrm((SEQ_LEN, EMBED_DIM), 0.02),
        'head_w': nrm((EMBED_DIM, NUM_CLASSES), 0.02),
        'head_b': jnp.zeros((1, NUM_CLASSES), jnp.float32),
        'layers': [],
    }
    for _ in range(NUM_LAYERS):
        params['layers'].append({
            'ln1_g': jnp.ones((1, EMBED_DIM), jnp.float32),
            'ln1_b': jnp.zeros((1, EMBED_DIM), jnp.float32),
            'wq': nrm((EMBED_DIM, EMBED_DIM), 0.05), 'bq': nrm((1, EMBED_DIM), 0.02),
            'wk': nrm((EMBED_DIM, EMBED_DIM), 0.05), 'bk': nrm((1, EMBED_DIM), 0.02),
            'wv': nrm((EMBED_DIM, EMBED_DIM), 0.05), 'bv': nrm((1, EMBED_DIM), 0.02),
            'wo': nrm((EMBED_DIM, EMBED_DIM), 0.05), 'bo': nrm((1, EMBED_DIM), 0.02),
            'ln2_g': jnp.ones((1, EMBED_DIM), jnp.float32),
            'ln2_b': jnp.zeros((1, EMBED_DIM), jnp.float32),
            'w1': nrm((EMBED_DIM, MLP_DIM), 0.05), 'b1': nrm((1, MLP_DIM), 0.02),
            'w2': nrm((MLP_DIM, EMBED_DIM), 0.05), 'b2': nrm((1, EMBED_DIM), 0.02),
        })
    return params


if __name__ == "__main__":
    key = jax.random.PRNGKey(0)
    kx, kp = jax.random.split(key)
    x = jax.random.normal(kx, (2, NUM_PATCHES, PATCH_DIM), dtype=jnp.float32)
    params = init_params(kp)

    # one-time packing (init-time, NOT in the per-call path)
    w_slab, v_slab = pack_params(params)
    jax.block_until_ready((w_slab, v_slab))

    logits = vit_forward(x, w_slab, v_slab)
    jax.block_until_ready(logits)

    ref = reference_forward(x, params)
    assert logits.shape == (2, NUM_CLASSES)
    assert jnp.allclose(logits, ref, rtol=2e-3, atol=2e-3), (logits, ref)
    print("KERNEL_OK")
</pallas_src>

<mosaic_0001>
module attributes {stable_mosaic.version = 11 : i64} {
  func.func @vit_fused_kernel(%arg0: memref<8x64xf32, #tpu.memory_space<vmem>>, %arg1: memref<416x128xf32, #tpu.memory_space<vmem>>, %arg2: memref<22x128xf32, #tpu.memory_space<vmem>>, %arg3: memref<2x128xf32, #tpu.memory_space<vmem>>) attributes {dimension_semantics = [], scalar_prefetch = 0 : i64, scratch_operands = 0 : i64, tpu.core_type = #tpu.core_type<tc>} {
    %c0 = arith.constant 0 : index
    %c0_0 = arith.constant 0 : index
    %0 = vector.load %arg2[%c0, %c0_0] : memref<22x128xf32, #tpu.memory_space<vmem>>, vector<22x128xf32>
    %c0_1 = arith.constant 0 : index
    %c0_2 = arith.constant 0 : index
    %1 = vector.load %arg1[%c0_1, %c0_2] : memref<416x128xf32, #tpu.memory_space<vmem>>, vector<64x128xf32>
    %c0_3 = arith.constant 0 : index
    %c0_4 = arith.constant 0 : index
    %2 = vector.load %arg0[%c0_3, %c0_4] : memref<8x64xf32, #tpu.memory_space<vmem>>, vector<8x64xf32>
    %cst = arith.constant dense<0.000000e+00> : vector<8x128xf32>
    %3 = tpu.matmul %2, %1, %cst {dimension_numbers = #tpu.dot_dimension_numbers<[1], [0], [0], [1], [0, 0, 1, 1], [], []>} : vector<8x64xf32>, vector<64x128xf32>, vector<8x128xf32> -> vector<8x128xf32>
    %4 = vector.extract_strided_slice %3 {offsets = [0, 0], sizes = [8, 32], strides = [1, 1]} : vector<8x128xf32> to vector<8x32xf32>
    %5 = vector.extract_strided_slice %0 {offsets = [1, 0], sizes = [4, 32], strides = [1, 1]} : vector<22x128xf32> to vector<4x32xf32>
    %6 = vector.extract_strided_slice %0 {offsets = [0, 0], sizes = [1, 32], strides = [1, 1]} : vector<22x128xf32> to vector<1x32xf32>
    %7 = vector.extract_strided_slice %4 {offsets = [0, 0], sizes = [4, 32], strides = [1, 1]} : vector<8x32xf32> to vector<4x32xf32>
    %8 = arith.addf %7, %5 : vector<4x32xf32>
    %9 = vector.extract_strided_slice %4 {offsets = [4, 0], sizes = [4, 32], strides = [1, 1]} : vector<8x32xf32> to vector<4x32xf32>
    %10 = arith.addf %9, %5 : vector<4x32xf32>
    %11 = tpu.concatenate %6, %8, %6, %10 in 0 : vector<1x32xf32>, vector<4x32xf32>, vector<1x32xf32>, vector<4x32xf32> -> vector<10x32xf32>
    %12 = tpu.iota {dimensions = array<i32: 0>} : vector<10x10xi32>
    %13 = tpu.iota {dimensions = array<i32: 1>} : vector<10x10xi32>
    %c0_i32 = arith.constant 0 : i32
    %14 = vector.broadcast %c0_i32 : i32 to vector<10x10xi32>
    %c0_i32_5 = arith.constant 0 : i32
    %15 = vector.broadcast %c0_i32_5 : i32 to vector<10x10xi32>
    %c5_i32 = arith.constant 5 : i32
    %16 = vector.broadcast %c5_i32 : i32 to vector<10x10xi32>
    %17 = arith.cmpi sge, %12, %16 : vector<10x10xi32>
    %c1_i32 = arith.constant 1 : i32
    %c0_i32_6 = arith.constant 0 : i32
    %18 = vector.broadcast %c1_i32 : i32 to vector<10x10xi32>
    %19 = vector.broadcast %c0_i32_6 : i32 to vector<10x10xi32>
    %20 = arith.select %17, %18, %19 : vector<10x10xi1>, vector<10x10xi32>
    %21 = arith.addi %14, %20 : vector<10x10xi32>
    %c5_i32_7 = arith.constant 5 : i32
    %22 = vector.broadcast %c5_i32_7 : i32 to vector<10x10xi32>
    %23 = arith.cmpi sge, %13, %22 : vector<10x10xi32>
    %c1_i32_8 = arith.constant 1 : i32
    %c0_i32_9 = arith.constant 0 : i32
    %24 = vector.broadcast %c1_i32_8 : i32 to vector<10x10xi32>
    %25 = vector.broadcast %c0_i32_9 : i32 to vector<10x10xi32>
    %26 = arith.select %23, %24, %25 : vector<10x10xi1>, vector<10x10xi32>
    %27 = arith.addi %15, %26 : vector<10x10xi32>
    %28 = arith.cmpi eq, %21, %27 : vector<10x10xi32>
    %cst_10 = arith.constant 0.000000e+00 : f32
    %cst_11 = arith.constant -1.000000e+30 : f32
    %29 = vector.broadcast %cst_10 : f32 to vector<10x10xf32>
    %30 = vector.broadcast %cst_11 : f32 to vector<10x10xf32>
    %31 = arith.select %28, %29, %30 : vector<10x10xi1>, vector<10x10xf32>
    %32 = vector.extract_strided_slice %0 {offsets = [5, 0], sizes = [1, 32], strides = [1, 1]} : vector<22x128xf32> to vector<1x32xf32>
    %33 = vector.extract_strided_slice %0 {offsets = [6, 0], sizes = [1, 32], strides = [1, 1]} : vector<22x128xf32> to vector<1x32xf32>
    %34 = vector.extract_strided_slice %0 {offsets = [7, 0], sizes = [1, 96], strides = [1, 1]} : vector<22x128xf32> to vector<1x96xf32>
    %35 = vector.extract_strided_slice %0 {offsets = [8, 0], sizes = [1, 32], strides = [1, 1]} : vector<22x128xf32> to vector<1x32xf32>
    %36 = vector.extract_strided_slice %0 {offsets = [9, 0], sizes = [1, 32], strides = [1, 1]} : vector<22x128xf32> to vector<1x32xf32>
    %37 = vector.extract_strided_slice %0 {offsets = [10, 0], sizes = [1, 32], strides = [1, 1]} : vector<22x128xf32> to vector<1x32xf32>
    %38 = vector.extract_strided_slice %0 {offsets = [11, 0], sizes = [1, 64], strides = [1, 1]} : vector<22x128xf32> to vector<1x64xf32>
    %39 = vector.extract_strided_slice %0 {offsets = [12, 0], sizes = [1, 32], strides = [1, 1]} : vector<22x128xf32> to vector<1x32xf32>
    %c64 = arith.constant 64 : index
    %c0_12 = arith.constant 0 : index
    %40 = vector.load %arg1[%c64, %c0_12] : memref<416x128xf32, #tpu.memory_space<vmem>>, vector<32x128xf32>
    %c96 = arith.constant 96 : index
    %c0_13 = arith.constant 0 : index
    %41 = vector.load %arg1[%c96, %c0_13] : memref<416x128xf32, #tpu.memory_space<vmem>>, vector<32x128xf32>
    %c128 = arith.constant 128 : index
    %c0_14 = arith.constant 0 : index
    %42 = vector.load %arg1[%c128, %c0_14] : memref<416x128xf32, #tpu.memory_space<vmem>>, vector<32x128xf32>
    %c160 = arith.constant 160 : index
    %c0_15 = arith.constant 0 : index
    %43 = vector.load %arg1[%c160, %c0_15] : memref<416x128xf32, #tpu.memory_space<vmem>>, vector<64x128xf32>
    %cst_16 = arith.constant dense<0.000000e+00> : vector<10xf32>
    %44 = vector.multi_reduction <add>, %11, %cst_16 [1] : vector<10x32xf32> to vector<10xf32>
    %45 = vector.shape_cast %44 : vector<10xf32> to vector<10x1xf32>
    %cst_17 = arith.constant 3.200000e+01 : f32
    %46 = vector.broadcast %cst_17 : f32 to vector<10x1xf32>
    %47 = arith.divf %45, %46 : vector<10x1xf32>
    %48 = vector.broadcast %47 : vector<10x1xf32> to vector<10x32xf32>
    %49 = arith.subf %11, %48 : vector<10x32xf32>
    %50 = arith.mulf %49, %49 : vector<10x32xf32>
    %cst_18 = arith.constant dense<0.000000e+00> : vector<10xf32>
    %51 = vector.multi_reduction <add>, %50, %cst_18 [1] : vector<10x32xf32> to vector<10xf32>
    %52 = vector.shape_cast %51 : vector<10xf32> to vector<10x1xf32>
    %cst_19 = arith.constant 3.200000e+01 : f32
    %53 = vector.broadcast %cst_19 : f32 to vector<10x1xf32>
    %54 = arith.divf %52, %53 : vector<10x1xf32>
    %55 = vector.broadcast %47 : vector<10x1xf32> to vector<10x32xf32>
    %56 = arith.subf %11, %55 : vector<10x32xf32>
    %cst_20 = arith.constant 9.99999974E-6 : f32
    %57 = vector.broadcast %cst_20 : f32 to vector<10x1xf32>
    %58 = arith.addf %54, %57 : vector<10x1xf32>
    %59 = math.rsqrt %58 : vector<10x1xf32>
    %60 = vector.broadcast %59 : vector<10x1xf32> to vector<10x32xf32>
    %61 = arith.mulf %56, %60 : vector<10x32xf32>
    %62 = vector.broadcast %32 : vector<1x32xf32> to vector<10x32xf32>
    %63 = arith.mulf %61, %62 : vector<10x32xf32>
    %64 = vector.broadcast %33 : vector<1x32xf32> to vector<10x32xf32>
    %65 = arith.addf %63, %64 : vector<10x32xf32>
    %cst_21 = arith.constant dense<0.000000e+00> : vector<10x128xf32>
    %66 = tpu.matmul %65, %40, %cst_21 {dimension_numbers = #tpu.dot_dimension_numbers<[1], [0], [0], [1], [0, 0, 1, 1], [], []>} : vector<10x32xf32>, vector<32x128xf32>, vector<10x128xf32> -> vector<10x128xf32>
    %67 = vector.extract_strided_slice %66 {offsets = [0, 0], sizes = [10, 96], strides = [1, 1]} : vector<10x128xf32> to vector<10x96xf32>
    %68 = vector.broadcast %34 : vector<1x96xf32> to vector<10x96xf32>
    %69 = arith.addf %67, %68 : vector<10x96xf32>
    %70 = vector.extract_strided_slice %69 {offsets = [0, 0], sizes = [10, 32], strides = [1, 1]} : vector<10x96xf32> to vector<10x32xf32>
    %cst_22 = arith.constant 0.353553385 : f32
    %71 = vector.broadcast %cst_22 : f32 to vector<10x32xf32>
    %72 = arith.mulf %70, %71 : vector<10x32xf32>
    %73 = vector.extract_strided_slice %69 {offsets = [0, 32], sizes = [10, 32], strides = [1, 1]} : vector<10x96xf32> to vector<10x32xf32>
    %74 = vector.extract_strided_slice %69 {offsets = [0, 64], sizes = [10, 32], strides = [1, 1]} : vector<10x96xf32> to vector<10x32xf32>
    %75 = vector.extract_strided_slice %72 {offsets = [0, 0], sizes = [10, 8], strides = [1, 1]} : vector<10x32xf32> to vector<10x8xf32>
    %76 = vector.extract_strided_slice %73 {offsets = [0, 0], sizes = [10, 8], strides = [1, 1]} : vector<10x32xf32> to vector<10x8xf32>
    %cst_23 = arith.constant dense<0.000000e+00> : vector<10x10xf32>
    %77 = tpu.matmul %75, %76, %cst_23 {dimension_numbers = #tpu.dot_dimension_numbers<[1], [1], [0], [0], [0, 0, 1, 0], [], []>} : vector<10x8xf32>, vector<10x8xf32>, vector<10x10xf32> -> vector<10x10xf32>
    %78 = arith.addf %77, %31 : vector<10x10xf32>
    %cst_24 = arith.constant dense<0xFF800000> : vector<10xf32>
    %79 = vector.multi_reduction <maximumf>, %78, %cst_24 [1] : vector<10x10xf32> to vector<10xf32>
    %80 = vector.shape_cast %79 : vector<10xf32> to vector<10x1xf32>
    %81 = vector.broadcast %80 : vector<10x1xf32> to vector<10x10xf32>
    %82 = arith.subf %78, %81 : vector<10x10xf32>
    %83 = math.exp %82 : vector<10x10xf32>
    %cst_25 = arith.constant dense<0.000000e+00> : vector<10xf32>
    %84 = vector.multi_reduction <add>, %83, %cst_25 [1] : vector<10x10xf32> to vector<10xf32>
    %85 = vector.shape_cast %84 : vector<10xf32> to vector<10x1xf32>
    %86 = tpu.reciprocal %85 {approx = true} : vector<10x1xf32> -> vector<10x1xf32>
    %87 = vector.broadcast %86 : vector<10x1xf32> to vector<10x10xf32>
    %88 = arith.mulf %83, %87 : vector<10x10xf32>
    %89 = vector.extract_strided_slice %74 {offsets = [0, 0], sizes = [10, 8], strides = [1, 1]} : vector<10x32xf32> to vector<10x8xf32>
    %cst_26 = arith.constant dense<0.000000e+00> : vector<10x8xf32>
    %90 = tpu.matmul %88, %89, %cst_26 {dimension_numbers = #tpu.dot_dimension_numbers<[1], [0], [0], [1], [0, 0, 1, 1], [], []>} : vector<10x10xf32>, vector<10x8xf32>, vector<10x8xf32> -> vector<10x8xf32>
    %91 = vector.extract_strided_slice %72 {offsets = [0, 8], sizes = [10, 8], strides = [1, 1]} : vector<10x32xf32> to vector<10x8xf32>
    %92 = vector.extract_strided_slice %73 {offsets = [0, 8], sizes = [10, 8], strides = [1, 1]} : vector<10x32xf32> to vector<10x8xf32>
    %cst_27 = arith.constant dense<0.000000e+00> : vector<10x10xf32>
    %93 = tpu.matmul %91, %92, %cst_27 {dimension_numbers = #tpu.dot_dimension_numbers<[1], [1], [0], [0], [0, 0, 1, 0], [], []>} : vector<10x8xf32>, vector<10x8xf32>, vector<10x10xf32> -> vector<10x10xf32>
    %94 = arith.addf %93, %31 : vector<10x10xf32>
    %cst_28 = arith.constant dense<0xFF800000> : vector<10xf32>
    %95 = vector.multi_reduction <maximumf>, %94, %cst_28 [1] : vector<10x10xf32> to vector<10xf32>
    %96 = vector.shape_cast %95 : vector<10xf32> to vector<10x1xf32>
    %97 = vector.broadcast %96 : vector<10x1xf32> to vector<10x10xf32>
    %98 = arith.subf %94, %97 : vector<10x10xf32>
    %99 = math.exp %98 : vector<10x10xf32>
    %cst_29 = arith.constant dense<0.000000e+00> : vector<10xf32>
    %100 = vector.multi_reduction <add>, %99, %cst_29 [1] : vector<10x10xf32> to vector<10xf32>
    %101 = vector.shape_cast %100 : vector<10xf32> to vector<10x1xf32>
    %102 = tpu.reciprocal %101 {approx = true} : vector<10x1xf32> -> vector<10x1xf32>
    %103 = vector.broadcast %102 : vector<10x1xf32> to vector<10x10xf32>
    %104 = arith.mulf %99, %103 : vector<10x10xf32>
    %105 = vector.extract_strided_slice %74 {offsets = [0, 8], sizes = [10, 8], strides = [1, 1]} : vector<10x32xf32> to vector<10x8xf32>
    %cst_30 = arith.constant dense<0.000000e+00> : vector<10x8xf32>
    %106 = tpu.matmul %104, %105, %cst_30 {dimension_numbers = #tpu.dot_dimension_numbers<[1], [0], [0], [1], [0, 0, 1, 1], [], []>} : vector<10x10xf32>, vector<10x8xf32>, vector<10x8xf32> -> vector<10x8xf32>
    %107 = vector.extract_strided_slice %72 {offsets = [0, 16], sizes = [10, 8], strides = [1, 1]} : vector<10x32xf32> to vector<10x8xf32>
    %108 = vector.extract_strided_slice %73 {offsets = [0, 16], sizes = [10, 8], strides = [1, 1]} : vector<10x32xf32> to vector<10x8xf32>
    %cst_31 = arith.constant dense<0.000000e+00> : vector<10x10xf32>
    %109 = tpu.matmul %107, %108, %cst_31 {dimension_numbers = #tpu.dot_dimension_numbers<[1], [1], [0], [0], [0, 0, 1, 0], [], []>} : vector<10x8xf32>, vector<10x8xf32>, vector<10x10xf32> -> vector<10x10xf32>
    %110 = arith.addf %109, %31 : vector<10x10xf32>
    %cst_32 = arith.constant dense<0xFF800000> : vector<10xf32>
    %111 = vector.multi_reduction <maximumf>, %110, %cst_32 [1] : vector<10x10xf32> to vector<10xf32>
    %112 = vector.shape_cast %111 : vector<10xf32> to vector<10x1xf32>
    %113 = vector.broadcast %112 : vector<10x1xf32> to vector<10x10xf32>
    %114 = arith.subf %110, %113 : vector<10x10xf32>
    %115 = math.exp %114 : vector<10x10xf32>
    %cst_33 = arith.constant dense<0.000000e+00> : vector<10xf32>
    %116 = vector.multi_reduction <add>, %115, %cst_33 [1] : vector<10x10xf32> to vector<10xf32>
    %117 = vector.shape_cast %116 : vector<10xf32> to vector<10x1xf32>
    %118 = tpu.reciprocal %117 {approx = true} : vector<10x1xf32> -> vector<10x1xf32>
    %119 = vector.broadcast %118 : vector<10x1xf32> to vector<10x10xf32>
    %120 = arith.mulf %115, %119 : vector<10x10xf32>
    %121 = vector.extract_strided_slice %74 {offsets = [0, 16], sizes = [10, 8], strides = [1, 1]} : vector<10x32xf32> to vector<10x8xf32>
    %cst_34 = arith.constant dense<0.000000e+00> : vector<10x8xf32>
    %122 = tpu.matmul %120, %121, %cst_34 {dimension_numbers = #tpu.dot_dimension_numbers<[1], [0], [0], [1], [0, 0, 1, 1], [], []>} : vector<10x10xf32>, vector<10x8xf32>, vector<10x8xf32> -> vector<10x8xf32>
    %123 = vector.extract_strided_slice %72 {offsets = [0, 24], sizes = [10, 8], strides = [1, 1]} : vector<10x32xf32> to vector<10x8xf32>
    %124 = vector.extract_strided_slice %73 {offsets = [0, 24], sizes = [10, 8], strides = [1, 1]} : vector<10x32xf32> to vector<10x8xf32>
    %cst_35 = arith.constant dense<0.000000e+00> : vector<10x10xf32>
    %125 = tpu.matmul %123, %124, %cst_35 {dimension_numbers = #tpu.dot_dimension_numbers<[1], [1], [0], [0], [0, 0, 1, 0], [], []>} : vector<10x8xf32>, vector<10x8xf32>, vector<10x10xf32> -> vector<10x10xf32>
    %126 = arith.addf %125, %31 : vector<10x10xf32>
    %cst_36 = arith.constant dense<0xFF800000> : vector<10xf32>
    %127 = vector.multi_reduction <maximumf>, %126, %cst_36 [1] : vector<10x10xf32> to vector<10xf32>
    %128 = vector.shape_cast %127 : vector<10xf32> to vector<10x1xf32>
    %129 = vector.broadcast %128 : vector<10x1xf32> to vector<10x10xf32>
    %130 = arith.subf %126, %129 : vector<10x10xf32>
    %131 = math.exp %130 : vector<10x10xf32>
    %cst_37 = arith.constant dense<0.000000e+00> : vector<10xf32>
    %132 = vector.multi_reduction <add>, %131, %cst_37 [1] : vector<10x10xf32> to vector<10xf32>
    %133 = vector.shape_cast %132 : vector<10xf32> to vector<10x1xf32>
    %134 = tpu.reciprocal %133 {approx = true} : vector<10x1xf32> -> vector<10x1xf32>
    %135 = vector.broadcast %134 : vector<10x1xf32> to vector<10x10xf32>
    %136 = arith.mulf %131, %135 : vector<10x10xf32>
    %137 = vector.extract_strided_slice %74 {offsets = [0, 24], sizes = [10, 8], strides = [1, 1]} : vector<10x32xf32> to vector<10x8xf32>
    %cst_38 = arith.constant dense<0.000000e+00> : vector<10x8xf32>
    %138 = tpu.matmul %136, %137, %cst_38 {dimension_numbers = #tpu.dot_dimension_numbers<[1], [0], [0], [1], [0, 0, 1, 1], [], []>} : vector<10x10xf32>, vector<10x8xf32>, vector<10x8xf32> -> vector<10x8xf32>
    %139 = tpu.concatenate %90, %106, %122, %138 in 1 : vector<10x8xf32>, vector<10x8xf32>, vector<10x8xf32>, vector<10x8xf32> -> vector<10x32xf32>
    %cst_39 = arith.constant dense<0.000000e+00> : vector<10x128xf32>
    %140 = tpu.matmul %139, %41, %cst_39 {dimension_numbers = #tpu.dot_dimension_numbers<[1], [0], [0], [1], [0, 0, 1, 1], [], []>} : vector<10x32xf32>, vector<32x128xf32>, vector<10x128xf32> -> vector<10x128xf32>
    %141 = vector.extract_strided_slice %140 {offsets = [0, 0], sizes = [10, 32], strides = [1, 1]} : vector<10x128xf32> to vector<10x32xf32>
    %142 = vector.broadcast %35 : vector<1x32xf32> to vector<10x32xf32>
    %143 = arith.addf %141, %142 : vector<10x32xf32>
    %144 = arith.addf %11, %143 : vector<10x32xf32>
    %cst_40 = arith.constant dense<0.000000e+00> : vector<10xf32>
    %145 = vector.multi_reduction <add>, %144, %cst_40 [1] : vector<10x32xf32> to vector<10xf32>
    %146 = vector.shape_cast %145 : vector<10xf32> to vector<10x1xf32>
    %cst_41 = arith.constant 3.200000e+01 : f32
    %147 = vector.broadcast %cst_41 : f32 to vector<10x1xf32>
    %148 = arith.divf %146, %147 : vector<10x1xf32>
    %149 = vector.broadcast %148 : vector<10x1xf32> to vector<10x32xf32>
    %150 = arith.subf %144, %149 : vector<10x32xf32>
    %151 = arith.mulf %150, %150 : vector<10x32xf32>
    %cst_42 = arith.constant dense<0.000000e+00> : vector<10xf32>
    %152 = vector.multi_reduction <add>, %151, %cst_42 [1] : vector<10x32xf32> to vector<10xf32>
    %153 = vector.shape_cast %152 : vector<10xf32> to vector<10x1xf32>
    %cst_43 = arith.constant 3.200000e+01 : f32
    %154 = vector.broadcast %cst_43 : f32 to vector<10x1xf32>
    %155 = arith.divf %153, %154 : vector<10x1xf32>
    %156 = vector.broadcast %148 : vector<10x1xf32> to vector<10x32xf32>
    %157 = arith.subf %144, %156 : vector<10x32xf32>
    %cst_44 = arith.constant 9.99999974E-6 : f32
    %158 = vector.broadcast %cst_44 : f32 to vector<10x1xf32>
    %159 = arith.addf %155, %158 : vector<10x1xf32>
    %160 = math.rsqrt %159 : vector<10x1xf32>
    %161 = vector.broadcast %160 : vector<10x1xf32> to vector<10x32xf32>
    %162 = arith.mulf %157, %161 : vector<10x32xf32>
    %163 = vector.broadcast %36 : vector<1x32xf32> to vector<10x32xf32>
    %164 = arith.mulf %162, %163 : vector<10x32xf32>
    %165 = vector.broadcast %37 : vector<1x32xf32> to vector<10x32xf32>
    %166 = arith.addf %164, %165 : vector<10x32xf32>
    %cst_45 = arith.constant dense<0.000000e+00> : vector<10x128xf32>
    %167 = tpu.matmul %166, %42, %cst_45 {dimension_numbers = #tpu.dot_dimension_numbers<[1], [0], [0], [1], [0, 0, 1, 1], [], []>} : vector<10x32xf32>, vector<32x128xf32>, vector<10x128xf32> -> vector<10x128xf32>
    %168 = vector.extract_strided_slice %167 {offsets = [0, 0], sizes = [10, 64], strides = [1, 1]} : vector<10x128xf32> to vector<10x64xf32>
    %169 = vector.broadcast %38 : vector<1x64xf32> to vector<10x64xf32>
    %170 = arith.addf %168, %169 : vector<10x64xf32>
    %cst_46 = arith.constant 5.000000e-01 : f32
    %171 = vector.broadcast %cst_46 : f32 to vector<10x64xf32>
    %172 = arith.mulf %171, %170 : vector<10x64xf32>
    %cst_47 = arith.constant 0.707106769 : f32
    %173 = vector.broadcast %cst_47 : f32 to vector<10x64xf32>
    %174 = arith.mulf %170, %173 : vector<10x64xf32>
    %cst_48 = arith.constant 0.000000e+00 : f32
    %175 = vector.broadcast %cst_48 : f32 to vector<10x64xf32>
    %176 = arith.cmpf oge, %174, %175 : vector<10x64xf32>
    %cst_49 = arith.constant 1.000000e+00 : f32
    %cst_50 = arith.constant -1.000000e+00 : f32
    %177 = vector.broadcast %cst_49 : f32 to vector<10x64xf32>
    %178 = vector.broadcast %cst_50 : f32 to vector<10x64xf32>
    %179 = arith.select %176, %177, %178 : vector<10x64xi1>, vector<10x64xf32>
    %180 = math.absf %174 : vector<10x64xf32>
    %cst_51 = arith.constant 0.327591091 : f32
    %181 = vector.broadcast %cst_51 : f32 to vector<10x64xf32>
    %182 = arith.mulf %181, %180 : vector<10x64xf32>
    %cst_52 = arith.constant 1.000000e+00 : f32
    %183 = vector.broadcast %cst_52 : f32 to vector<10x64xf32>
    %184 = arith.addf %183, %182 : vector<10x64xf32>
    %cst_53 = arith.constant 1.000000e+00 : f32
    %185 = vector.broadcast %cst_53 : f32 to vector<10x64xf32>
    %186 = arith.divf %185, %184 : vector<10x64xf32>
    %cst_54 = arith.constant 1.06140542 : f32
    %187 = vector.broadcast %cst_54 : f32 to vector<10x64xf32>
    %188 = arith.mulf %187, %186 : vector<10x64xf32>
    %cst_55 = arith.constant -1.45315206 : f32
    %189 = vector.broadcast %cst_55 : f32 to vector<10x64xf32>
    %190 = arith.addf %188, %189 : vector<10x64xf32>
    %191 = arith.mulf %190, %186 : vector<10x64xf32>
    %cst_56 = arith.constant 1.42141378 : f32
    %192 = vector.broadcast %cst_56 : f32 to vector<10x64xf32>
    %193 = arith.addf %191, %192 : vector<10x64xf32>
    %194 = arith.mulf %193, %186 : vector<10x64xf32>
    %cst_57 = arith.constant -0.284496725 : f32
    %195 = vector.broadcast %cst_57 : f32 to vector<10x64xf32>
    %196 = arith.addf %194, %195 : vector<10x64xf32>
    %197 = arith.mulf %196, %186 : vector<10x64xf32>
    %cst_58 = arith.constant 0.254829586 : f32
    %198 = vector.broadcast %cst_58 : f32 to vector<10x64xf32>
    %199 = arith.addf %197, %198 : vector<10x64xf32>
    %200 = arith.mulf %199, %186 : vector<10x64xf32>
    %cst_59 = arith.constant 0.000000e+00 : f32
    %201 = vector.broadcast %cst_59 : f32 to vector<10x64xf32>
    %202 = arith.subf %201, %180 : vector<10x64xf32>
    %203 = arith.mulf %202, %180 : vector<10x64xf32>
    %204 = math.exp %203 : vector<10x64xf32>
    %205 = arith.mulf %200, %204 : vector<10x64xf32>
    %cst_60 = arith.constant 1.000000e+00 : f32
    %206 = vector.broadcast %cst_60 : f32 to vector<10x64xf32>
    %207 = arith.subf %206, %205 : vector<10x64xf32>
    %208 = arith.mulf %179, %207 : vector<10x64xf32>
    %cst_61 = arith.constant 1.000000e+00 : f32
    %209 = vector.broadcast %cst_61 : f32 to vector<10x64xf32>
    %210 = arith.addf %209, %208 : vector<10x64xf32>
    %211 = arith.mulf %172, %210 : vector<10x64xf32>
    %cst_62 = arith.constant dense<0.000000e+00> : vector<10x128xf32>
    %212 = tpu.matmul %211, %43, %cst_62 {dimension_numbers = #tpu.dot_dimension_numbers<[1], [0], [0], [1], [0, 0, 1, 1], [], []>} : vector<10x64xf32>, vector<64x128xf32>, vector<10x128xf32> -> vector<10x128xf32>
    %213 = vector.extract_strided_slice %212 {offsets = [0, 0], sizes = [10, 32], strides = [1, 1]} : vector<10x128xf32> to vector<10x32xf32>
    %214 = arith.addf %144, %213 : vector<10x32xf32>
    %215 = vector.broadcast %39 : vector<1x32xf32> to vector<10x32xf32>
    %216 = arith.addf %214, %215 : vector<10x32xf32>
    %217 = vector.extract_strided_slice %0 {offsets = [13, 0], sizes = [1, 32], strides = [1, 1]} : vector<22x128xf32> to vector<1x32xf32>
    %218 = vector.extract_strided_slice %0 {offsets = [14, 0], sizes = [1, 32], strides = [1, 1]} : vector<22x128xf32> to vector<1x32xf32>
    %219 = vector.extract_strided_slice %0 {offsets = [15, 0], sizes = [1, 96], strides = [1, 1]} : vector<22x128xf32> to vector<1x96xf32>
    %220 = vector.extract_strided_slice %0 {offsets = [16, 0], sizes = [1, 32], strides = [1, 1]} : vector<22x128xf32> to vector<1x32xf32>
    %221 = vector.extract_strided_slice %0 {offsets = [17, 0], sizes = [1, 32], strides = [1, 1]} : vector<22x128xf32> to vector<1x32xf32>
    %222 = vector.extract_strided_slice %0 {offsets = [18, 0], sizes = [1, 32], strides = [1, 1]} : vector<22x128xf32> to vector<1x32xf32>
    %223 = vector.extract_strided_slice %0 {offsets = [19, 0], sizes = [1, 64], strides = [1, 1]} : vector<22x128xf32> to vector<1x64xf32>
    %224 = vector.extract_strided_slice %0 {offsets = [20, 0], sizes = [1, 32], strides = [1, 1]} : vector<22x128xf32> to vector<1x32xf32>
    %c224 = arith.constant 224 : index
    %c0_63 = arith.constant 0 : index
    %225 = vector.load %arg1[%c224, %c0_63] : memref<416x128xf32, #tpu.memory_space<vmem>>, vector<32x128xf32>
    %c256 = arith.constant 256 : index
    %c0_64 = arith.constant 0 : index
    %226 = vector.load %arg1[%c256, %c0_64] : memref<416x128xf32, #tpu.memory_space<vmem>>, vector<32x128xf32>
    %c288 = arith.constant 288 : index
    %c0_65 = arith.constant 0 : index
    %227 = vector.load %arg1[%c288, %c0_65] : memref<416x128xf32, #tpu.memory_space<vmem>>, vector<32x128xf32>
    %c320 = arith.constant 320 : index
    %c0_66 = arith.constant 0 : index
    %228 = vector.load %arg1[%c320, %c0_66] : memref<416x128xf32, #tpu.memory_space<vmem>>, vector<64x128xf32>
    %cst_67 = arith.constant dense<0.000000e+00> : vector<10xf32>
    %229 = vector.multi_reduction <add>, %216, %cst_67 [1] : vector<10x32xf32> to vector<10xf32>
    %230 = vector.shape_cast %229 : vector<10xf32> to vector<10x1xf32>
    %cst_68 = arith.constant 3.200000e+01 : f32
    %231 = vector.broadcast %cst_68 : f32 to vector<10x1xf32>
    %232 = arith.divf %230, %231 : vector<10x1xf32>
    %233 = vector.broadcast %232 : vector<10x1xf32> to vector<10x32xf32>
    %234 = arith.subf %216, %233 : vector<10x32xf32>
    %235 = arith.mulf %234, %234 : vector<10x32xf32>
    %cst_69 = arith.constant dense<0.000000e+00> : vector<10xf32>
    %236 = vector.multi_reduction <add>, %235, %cst_69 [1] : vector<10x32xf32> to vector<10xf32>
    %237 = vector.shape_cast %236 : vector<10xf32> to vector<10x1xf32>
    %cst_70 = arith.constant 3.200000e+01 : f32
    %238 = vector.broadcast %cst_70 : f32 to vector<10x1xf32>
    %239 = arith.divf %237, %238 : vector<10x1xf32>
    %240 = vector.broadcast %232 : vector<10x1xf32> to vector<10x32xf32>
    %241 = arith.subf %216, %240 : vector<10x32xf32>
    %cst_71 = arith.constant 9.99999974E-6 : f32
    %242 = vector.broadcast %cst_71 : f32 to vector<10x1xf32>
    %243 = arith.addf %239, %242 : vector<10x1xf32>
    %244 = math.rsqrt %243 : vector<10x1xf32>
    %245 = vector.broadcast %244 : vector<10x1xf32> to vector<10x32xf32>
    %246 = arith.mulf %241, %245 : vector<10x32xf32>
    %247 = vector.broadcast %217 : vector<1x32xf32> to vector<10x32xf32>
    %248 = arith.mulf %246, %247 : vector<10x32xf32>
    %249 = vector.broadcast %218 : vector<1x32xf32> to vector<10x32xf32>
    %250 = arith.addf %248, %249 : vector<10x32xf32>
    %cst_72 = arith.constant dense<0.000000e+00> : vector<10x128xf32>
    %251 = tpu.matmul %250, %225, %cst_72 {dimension_numbers = #tpu.dot_dimension_numbers<[1], [0], [0], [1], [0, 0, 1, 1], [], []>} : vector<10x32xf32>, vector<32x128xf32>, vector<10x128xf32> -> vector<10x128xf32>
    %252 = vector.extract_strided_slice %251 {offsets = [0, 0], sizes = [10, 96], strides = [1, 1]} : vector<10x128xf32> to vector<10x96xf32>
    %253 = vector.broadcast %219 : vector<1x96xf32> to vector<10x96xf32>
    %254 = arith.addf %252, %253 : vector<10x96xf32>
    %255 = vector.extract_strided_slice %254 {offsets = [0, 0], sizes = [10, 32], strides = [1, 1]} : vector<10x96xf32> to vector<10x32xf32>
    %cst_73 = arith.constant 0.353553385 : f32
    %256 = vector.broadcast %cst_73 : f32 to vector<10x32xf32>
    %257 = arith.mulf %255, %256 : vector<10x32xf32>
    %258 = vector.extract_strided_slice %254 {offsets = [0, 32], sizes = [10, 32], strides = [1, 1]} : vector<10x96xf32> to vector<10x32xf32>
    %259 = vector.extract_strided_slice %254 {offsets = [0, 64], sizes = [10, 32], strides = [1, 1]} : vector<10x96xf32> to vector<10x32xf32>
    %260 = vector.extract_strided_slice %257 {offsets = [0, 0], sizes = [10, 8], strides = [1, 1]} : vector<10x32xf32> to vector<10x8xf32>
    %261 = vector.extract_strided_slice %258 {offsets = [0, 0], sizes = [10, 8], strides = [1, 1]} : vector<10x32xf32> to vector<10x8xf32>
    %cst_74 = arith.constant dense<0.000000e+00> : vector<10x10xf32>
    %262 = tpu.matmul %260, %261, %cst_74 {dimension_numbers = #tpu.dot_dimension_numbers<[1], [1], [0], [0], [0, 0, 1, 0], [], []>} : vector<10x8xf32>, vector<10x8xf32>, vector<10x10xf32> -> vector<10x10xf32>
    %263 = arith.addf %262, %31 : vector<10x10xf32>
    %cst_75 = arith.constant dense<0xFF800000> : vector<10xf32>
    %264 = vector.multi_reduction <maximumf>, %263, %cst_75 [1] : vector<10x10xf32> to vector<10xf32>
    %265 = vector.shape_cast %264 : vector<10xf32> to vector<10x1xf32>
    %266 = vector.broadcast %265 : vector<10x1xf32> to vector<10x10xf32>
    %267 = arith.subf %263, %266 : vector<10x10xf32>
    %268 = math.exp %267 : vector<10x10xf32>
    %cst_76 = arith.constant dense<0.000000e+00> : vector<10xf32>
    %269 = vector.multi_reduction <add>, %268, %cst_76 [1] : vector<10x10xf32> to vector<10xf32>
    %270 = vector.shape_cast %269 : vector<10xf32> to vector<10x1xf32>
    %271 = tpu.reciprocal %270 {approx = true} : vector<10x1xf32> -> vector<10x1xf32>
    %272 = vector.broadcast %271 : vector<10x1xf32> to vector<10x10xf32>
    %273 = arith.mulf %268, %272 : vector<10x10xf32>
    %274 = vector.extract_strided_slice %259 {offsets = [0, 0], sizes = [10, 8], strides = [1, 1]} : vector<10x32xf32> to vector<10x8xf32>
    %cst_77 = arith.constant dense<0.000000e+00> : vector<10x8xf32>
    %275 = tpu.matmul %273, %274, %cst_77 {dimension_numbers = #tpu.dot_dimension_numbers<[1], [0], [0], [1], [0, 0, 1, 1], [], []>} : vector<10x10xf32>, vector<10x8xf32>, vector<10x8xf32> -> vector<10x8xf32>
    %276 = vector.extract_strided_slice %257 {offsets = [0, 8], sizes = [10, 8], strides = [1, 1]} : vector<10x32xf32> to vector<10x8xf32>
    %277 = vector.extract_strided_slice %258 {offsets = [0, 8], sizes = [10, 8], strides = [1, 1]} : vector<10x32xf32> to vector<10x8xf32>
    %cst_78 = arith.constant dense<0.000000e+00> : vector<10x10xf32>
    %278 = tpu.matmul %276, %277, %cst_78 {dimension_numbers = #tpu.dot_dimension_numbers<[1], [1], [0], [0], [0, 0, 1, 0], [], []>} : vector<10x8xf32>, vector<10x8xf32>, vector<10x10xf32> -> vector<10x10xf32>
    %279 = arith.addf %278, %31 : vector<10x10xf32>
    %cst_79 = arith.constant dense<0xFF800000> : vector<10xf32>
    %280 = vector.multi_reduction <maximumf>, %279, %cst_79 [1] : vector<10x10xf32> to vector<10xf32>
    %281 = vector.shape_cast %280 : vector<10xf32> to vector<10x1xf32>
    %282 = vector.broadcast %281 : vector<10x1xf32> to vector<10x10xf32>
    %283 = arith.subf %279, %282 : vector<10x10xf32>
    %284 = math.exp %283 : vector<10x10xf32>
    %cst_80 = arith.constant dense<0.000000e+00> : vector<10xf32>
    %285 = vector.multi_reduction <add>, %284, %cst_80 [1] : vector<10x10xf32> to vector<10xf32>
    %286 = vector.shape_cast %285 : vector<10xf32> to vector<10x1xf32>
    %287 = tpu.reciprocal %286 {approx = true} : vector<10x1xf32> -> vector<10x1xf32>
    %288 = vector.broadcast %287 : vector<10x1xf32> to vector<10x10xf32>
    %289 = arith.mulf %284, %288 : vector<10x10xf32>
    %290 = vector.extract_strided_slice %259 {offsets = [0, 8], sizes = [10, 8], strides = [1, 1]} : vector<10x32xf32> to vector<10x8xf32>
    %cst_81 = arith.constant dense<0.000000e+00> : vector<10x8xf32>
    %291 = tpu.matmul %289, %290, %cst_81 {dimension_numbers = #tpu.dot_dimension_numbers<[1], [0], [0], [1], [0, 0, 1, 1], [], []>} : vector<10x10xf32>, vector<10x8xf32>, vector<10x8xf32> -> vector<10x8xf32>
    %292 = vector.extract_strided_slice %257 {offsets = [0, 16], sizes = [10, 8], strides = [1, 1]} : vector<10x32xf32> to vector<10x8xf32>
    %293 = vector.extract_strided_slice %258 {offsets = [0, 16], sizes = [10, 8], strides = [1, 1]} : vector<10x32xf32> to vector<10x8xf32>
    %cst_82 = arith.constant dense<0.000000e+00> : vector<10x10xf32>
    %294 = tpu.matmul %292, %293, %cst_82 {dimension_numbers = #tpu.dot_dimension_numbers<[1], [1], [0], [0], [0, 0, 1, 0], [], []>} : vector<10x8xf32>, vector<10x8xf32>, vector<10x10xf32> -> vector<10x10xf32>
    %295 = arith.addf %294, %31 : vector<10x10xf32>
    %cst_83 = arith.constant dense<0xFF800000> : vector<10xf32>
    %296 = vector.multi_reduction <maximumf>, %295, %cst_83 [1] : vector<10x10xf32> to vector<10xf32>
    %297 = vector.shape_cast %296 : vector<10xf32> to vector<10x1xf32>
    %298 = vector.broadcast %297 : vector<10x1xf32> to vector<10x10xf32>
    %299 = arith.subf %295, %298 : vector<10x10xf32>
    %300 = math.exp %299 : vector<10x10xf32>
    %cst_84 = arith.constant dense<0.000000e+00> : vector<10xf32>
    %301 = vector.multi_reduction <add>, %300, %cst_84 [1] : vector<10x10xf32> to vector<10xf32>
    %302 = vector.shape_cast %301 : vector<10xf32> to vector<10x1xf32>
    %303 = tpu.reciprocal %302 {approx = true} : vector<10x1xf32> -> vector<10x1xf32>
    %304 = vector.broadcast %303 : vector<10x1xf32> to vector<10x10xf32>
    %305 = arith.mulf %300, %304 : vector<10x10xf32>
    %306 = vector.extract_strided_slice %259 {offsets = [0, 16], sizes = [10, 8], strides = [1, 1]} : vector<10x32xf32> to vector<10x8xf32>
    %cst_85 = arith.constant dense<0.000000e+00> : vector<10x8xf32>
    %307 = tpu.matmul %305, %306, %cst_85 {dimension_numbers = #tpu.dot_dimension_numbers<[1], [0], [0], [1], [0, 0, 1, 1], [], []>} : vector<10x10xf32>, vector<10x8xf32>, vector<10x8xf32> -> vector<10x8xf32>
    %308 = vector.extract_strided_slice %257 {offsets = [0, 24], sizes = [10, 8], strides = [1, 1]} : vector<10x32xf32> to vector<10x8xf32>
    %309 = vector.extract_strided_slice %258 {offsets = [0, 24], sizes = [10, 8], strides = [1, 1]} : vector<10x32xf32> to vector<10x8xf32>
    %cst_86 = arith.constant dense<0.000000e+00> : vector<10x10xf32>
    %310 = tpu.matmul %308, %309, %cst_86 {dimension_numbers = #tpu.dot_dimension_numbers<[1], [1], [0], [0], [0, 0, 1, 0], [], []>} : vector<10x8xf32>, vector<10x8xf32>, vector<10x10xf32> -> vector<10x10xf32>
    %311 = arith.addf %310, %31 : vector<10x10xf32>
    %cst_87 = arith.constant dense<0xFF800000> : vector<10xf32>
    %312 = vector.multi_reduction <maximumf>, %311, %cst_87 [1] : vector<10x10xf32> to vector<10xf32>
    %313 = vector.shape_cast %312 : vector<10xf32> to vector<10x1xf32>
    %314 = vector.broadcast %313 : vector<10x1xf32> to vector<10x10xf32>
    %315 = arith.subf %311, %314 : vector<10x10xf32>
    %316 = math.exp %315 : vector<10x10xf32>
    %cst_88 = arith.constant dense<0.000000e+00> : vector<10xf32>
    %317 = vector.multi_reduction <add>, %316, %cst_88 [1] : vector<10x10xf32> to vector<10xf32>
    %318 = vector.shape_cast %317 : vector<10xf32> to vector<10x1xf32>
    %319 = tpu.reciprocal %318 {approx = true} : vector<10x1xf32> -> vector<10x1xf32>
    %320 = vector.broadcast %319 : vector<10x1xf32> to vector<10x10xf32>
    %321 = arith.mulf %316, %320 : vector<10x10xf32>
    %322 = vector.extract_strided_slice %259 {offsets = [0, 24], sizes = [10, 8], strides = [1, 1]} : vector<10x32xf32> to vector<10x8xf32>
    %cst_89 = arith.constant dense<0.000000e+00> : vector<10x8xf32>
    %323 = tpu.matmul %321, %322, %cst_89 {dimension_numbers = #tpu.dot_dimension_numbers<[1], [0], [0], [1], [0, 0, 1, 1], [], []>} : vector<10x10xf32>, vector<10x8xf32>, vector<10x8xf32> -> vector<10x8xf32>
    %324 = tpu.concatenate %275, %291, %307, %323 in 1 : vector<10x8xf32>, vector<10x8xf32>, vector<10x8xf32>, vector<10x8xf32> -> vector<10x32xf32>
    %cst_90 = arith.constant dense<0.000000e+00> : vector<10x128xf32>
    %325 = tpu.matmul %324, %226, %cst_90 {dimension_numbers = #tpu.dot_dimension_numbers<[1], [0], [0], [1], [0, 0, 1, 1], [], []>} : vector<10x32xf32>, vector<32x128xf32>, vector<10x128xf32> -> vector<10x128xf32>
    %326 = vector.extract_strided_slice %325 {offsets = [0, 0], sizes = [10, 32], strides = [1, 1]} : vector<10x128xf32> to vector<10x32xf32>
    %327 = vector.broadcast %220 : vector<1x32xf32> to vector<10x32xf32>
    %328 = arith.addf %326, %327 : vector<10x32xf32>
    %329 = arith.addf %216, %328 : vector<10x32xf32>
    %cst_91 = arith.constant dense<0.000000e+00> : vector<10xf32>
    %330 = vector.multi_reduction <add>, %329, %cst_91 [1] : vector<10x32xf32> to vector<10xf32>
    %331 = vector.shape_cast %330 : vector<10xf32> to vector<10x1xf32>
    %cst_92 = arith.constant 3.200000e+01 : f32
    %332 = vector.broadcast %cst_92 : f32 to vector<10x1xf32>
    %333 = arith.divf %331, %332 : vector<10x1xf32>
    %334 = vector.broadcast %333 : vector<10x1xf32> to vector<10x32xf32>
    %335 = arith.subf %329, %334 : vector<10x32xf32>
    %336 = arith.mulf %335, %335 : vector<10x32xf32>
    %cst_93 = arith.constant dense<0.000000e+00> : vector<10xf32>
    %337 = vector.multi_reduction <add>, %336, %cst_93 [1] : vector<10x32xf32> to vector<10xf32>
    %338 = vector.shape_cast %337 : vector<10xf32> to vector<10x1xf32>
    %cst_94 = arith.constant 3.200000e+01 : f32
    %339 = vector.broadcast %cst_94 : f32 to vector<10x1xf32>
    %340 = arith.divf %338, %339 : vector<10x1xf32>
    %341 = vector.broadcast %333 : vector<10x1xf32> to vector<10x32xf32>
    %342 = arith.subf %329, %341 : vector<10x32xf32>
    %cst_95 = arith.constant 9.99999974E-6 : f32
    %343 = vector.broadcast %cst_95 : f32 to vector<10x1xf32>
    %344 = arith.addf %340, %343 : vector<10x1xf32>
    %345 = math.rsqrt %344 : vector<10x1xf32>
    %346 = vector.broadcast %345 : vector<10x1xf32> to vector<10x32xf32>
    %347 = arith.mulf %342, %346 : vector<10x32xf32>
    %348 = vector.broadcast %221 : vector<1x32xf32> to vector<10x32xf32>
    %349 = arith.mulf %347, %348 : vector<10x32xf32>
    %350 = vector.broadcast %222 : vector<1x32xf32> to vector<10x32xf32>
    %351 = arith.addf %349, %350 : vector<10x32xf32>
    %cst_96 = arith.constant dense<0.000000e+00> : vector<10x128xf32>
    %352 = tpu.matmul %351, %227, %cst_96 {dimension_numbers = #tpu.dot_dimension_numbers<[1], [0], [0], [1], [0, 0, 1, 1], [], []>} : vector<10x32xf32>, vector<32x128xf32>, vector<10x128xf32> -> vector<10x128xf32>
    %353 = vector.extract_strided_slice %352 {offsets = [0, 0], sizes = [10, 64], strides = [1, 1]} : vector<10x128xf32> to vector<10x64xf32>
    %354 = vector.broadcast %223 : vector<1x64xf32> to vector<10x64xf32>
    %355 = arith.addf %353, %354 : vector<10x64xf32>
    %cst_97 = arith.constant 5.000000e-01 : f32
    %356 = vector.broadcast %cst_97 : f32 to vector<10x64xf32>
    %357 = arith.mulf %356, %355 : vector<10x64xf32>
    %cst_98 = arith.constant 0.707106769 : f32
    %358 = vector.broadcast %cst_98 : f32 to vector<10x64xf32>
    %359 = arith.mulf %355, %358 : vector<10x64xf32>
    %cst_99 = arith.constant 0.000000e+00 : f32
    %360 = vector.broadcast %cst_99 : f32 to vector<10x64xf32>
    %361 = arith.cmpf oge, %359, %360 : vector<10x64xf32>
    %cst_100 = arith.constant 1.000000e+00 : f32
    %cst_101 = arith.constant -1.000000e+00 : f32
    %362 = vector.broadcast %cst_100 : f32 to vector<10x64xf32>
    %363 = vector.broadcast %cst_101 : f32 to vector<10x64xf32>
    %364 = arith.select %361, %362, %363 : vector<10x64xi1>, vector<10x64xf32>
    %365 = math.absf %359 : vector<10x64xf32>
    %cst_102 = arith.constant 0.327591091 : f32
    %366 = vector.broadcast %cst_102 : f32 to vector<10x64xf32>
    %367 = arith.mulf %366, %365 : vector<10x64xf32>
    %cst_103 = arith.constant 1.000000e+00 : f32
    %368 = vector.broadcast %cst_103 : f32 to vector<10x64xf32>
    %369 = arith.addf %368, %367 : vector<10x64xf32>
    %cst_104 = arith.constant 1.000000e+00 : f32
    %370 = vector.broadcast %cst_104 : f32 to vector<10x64xf32>
    %371 = arith.divf %370, %369 : vector<10x64xf32>
    %cst_105 = arith.constant 1.06140542 : f32
    %372 = vector.broadcast %cst_105 : f32 to vector<10x64xf32>
    %373 = arith.mulf %372, %371 : vector<10x64xf32>
    %cst_106 = arith.constant -1.45315206 : f32
    %374 = vector.broadcast %cst_106 : f32 to vector<10x64xf32>
    %375 = arith.addf %373, %374 : vector<10x64xf32>
    %376 = arith.mulf %375, %371 : vector<10x64xf32>
    %cst_107 = arith.constant 1.42141378 : f32
    %377 = vector.broadcast %cst_107 : f32 to vector<10x64xf32>
    %378 = arith.addf %376, %377 : vector<10x64xf32>
    %379 = arith.mulf %378, %371 : vector<10x64xf32>
    %cst_108 = arith.constant -0.284496725 : f32
    %380 = vector.broadcast %cst_108 : f32 to vector<10x64xf32>
    %381 = arith.addf %379, %380 : vector<10x64xf32>
    %382 = arith.mulf %381, %371 : vector<10x64xf32>
    %cst_109 = arith.constant 0.254829586 : f32
    %383 = vector.broadcast %cst_109 : f32 to vector<10x64xf32>
    %384 = arith.addf %382, %383 : vector<10x64xf32>
    %385 = arith.mulf %384, %371 : vector<10x64xf32>
    %cst_110 = arith.constant 0.000000e+00 : f32
    %386 = vector.broadcast %cst_110 : f32 to vector<10x64xf32>
    %387 = arith.subf %386, %365 : vector<10x64xf32>
    %388 = arith.mulf %387, %365 : vector<10x64xf32>
    %389 = math.exp %388 : vector<10x64xf32>
    %390 = arith.mulf %385, %389 : vector<10x64xf32>
    %cst_111 = arith.constant 1.000000e+00 : f32
    %391 = vector.broadcast %cst_111 : f32 to vector<10x64xf32>
    %392 = arith.subf %391, %390 : vector<10x64xf32>
    %393 = arith.mulf %364, %392 : vector<10x64xf32>
    %cst_112 = arith.constant 1.000000e+00 : f32
    %394 = vector.broadcast %cst_112 : f32 to vector<10x64xf32>
    %395 = arith.addf %394, %393 : vector<10x64xf32>
    %396 = arith.mulf %357, %395 : vector<10x64xf32>
    %cst_113 = arith.constant dense<0.000000e+00> : vector<10x128xf32>
    %397 = tpu.matmul %396, %228, %cst_113 {dimension_numbers = #tpu.dot_dimension_numbers<[1], [0], [0], [1], [0, 0, 1, 1], [], []>} : vector<10x64xf32>, vector<64x128xf32>, vector<10x128xf32> -> vector<10x128xf32>
    %398 = vector.extract_strided_slice %397 {offsets = [0, 0], sizes = [10, 32], strides = [1, 1]} : vector<10x128xf32> to vector<10x32xf32>
    %399 = arith.addf %329, %398 : vector<10x32xf32>
    %400 = vector.broadcast %224 : vector<1x32xf32> to vector<10x32xf32>
    %401 = arith.addf %399, %400 : vector<10x32xf32>
    %402 = vector.extract_strided_slice %401 {offsets = [0, 0], sizes = [1, 32], strides = [1, 1]} : vector<10x32xf32> to vector<1x32xf32>
    %403 = vector.extract_strided_slice %401 {offsets = [5, 0], sizes = [1, 32], strides = [1, 1]} : vector<10x32xf32> to vector<1x32xf32>
    %404 = tpu.concatenate %402, %403 in 0 : vector<1x32xf32>, vector<1x32xf32> -> vector<2x32xf32>
    %c384 = arith.constant 384 : index
    %c0_114 = arith.constant 0 : index
    %405 = vector.load %arg1[%c384, %c0_114] : memref<416x128xf32, #tpu.memory_space<vmem>>, vector<32x128xf32>
    %406 = vector.extract_strided_slice %0 {offsets = [21, 0], sizes = [1, 128], strides = [1, 1]} : vector<22x128xf32> to vector<1x128xf32>
    %cst_115 = arith.constant dense<0.000000e+00> : vector<2x128xf32>
    %407 = tpu.matmul %404, %405, %cst_115 {dimension_numbers = #tpu.dot_dimension_numbers<[1], [0], [0], [1], [0, 0, 1, 1], [], []>} : vector<2x32xf32>, vector<32x128xf32>, vector<2x128xf32> -> vector<2x128xf32>
    %408 = vector.broadcast %406 : vector<1x128xf32> to vector<2x128xf32>
    %409 = arith.addf %407, %408 : vector<2x128xf32>
    %c0_116 = arith.constant 0 : index
    %c0_117 = arith.constant 0 : index
    %410 = vector.load %arg3[%c0_116, %c0_117] : memref<2x128xf32, #tpu.memory_space<vmem>>, vector<2x128xf32>
    tpu.vector_store %arg3[%c0_116, %c0_117], %409 {strides = array<i32>} : memref<2x128xf32, #tpu.memory_space<vmem>>, vector<2x128xf32>,
    return
  }
}

</mosaic_0001>

<bundles_post_ra>
// kernel: vit_forward.1
= control target key start
LH: loop header
LB: loop body
LE: loop exit
PB: predicated region body
PF: predicated region fallthrough
CT: control target
= control target key end

     0   :  { %8 = vsyncpa [#allocation3], 0  ;;  %s4440_s0 = inlined_call_operand.hbm [shape: f32[8,64], index: 0, kind: input, shape index: {}]   ;;  %s4441_s1 = inlined_call_operand.hbm [shape: f32[416,128], index: 1, kind: input, shape index: {}]   ;;  %s4442_s2 = inlined_call_operand.hbm [shape: f32[22,128], index: 2, kind: input, shape index: {}]   ;;  %s4443_s3 = inlined_call_operand.hbm [shape: f32[2,128], index: 3, kind: output, shape index: {}]  }
   0x1   :  { %9 = vsyncpa [#allocation6], 0 }
   0x2   :  { %10 = vsyncpa [#allocation4], 0  ;;  %s3905_s12 = smov [#allocation5]   ;;  %s3811_s16 = scalar_lea.hbm %s4441_s1, 6656 }
   0x3   :  { %s26_s13 = sshll.u32 %s3905_s12, 4  ;;  %p3812_p0 = scmp.ne.s32.totalorder %s4441_s1, %s3811_s16  ;;  %s27_s13 = int_to_ptr.vmem [resolvable:$true] %s26_s13 }
   0x4   :  { %p3815_p1 = scmp.lt.u32.totalorder %s3811_s16, %s4441_s1 }
   0x6   :  { %p3817_p2 = pnand %p3815_p1, %p3812_p0 }
   0x8   :  { %3820 = shalt.err (!%p3817_p2)
}
   0x9   :  { %s3821_s21 = scalar_lea.vmem %s27_s13, 6656  ;;  %p3826_p4 = scmp.lt.s32.totalorder %s27_s13, %s27_s13 }
   0xa   :  { %p3822_p3 = scmp.ne.s32.totalorder %s27_s13, %s3821_s21  ;;  %p3827_p5 = scmp.lt.s32.totalorder %s3821_s21, %s3821_s21 }
   0xc   :  { %p3828_p6 = por %p3827_p5, %p3826_p4 }
   0xe   :  { %p3829_p7 = pnand %p3828_p6, %p3822_p3 }
  0x10   :  { %3832 = shalt.err (!%p3829_p7)
}
  0x11   :  { %s3906_s22 = smov 128   ;;  %s3907_s23 = smov 8  }
  0x12   :  { %32 = dma.hbm_to_vmem [thread:$0]  %s4441_s1, 6656, %s27_s13, [#allocation6], %s3906_s22, %s3906_s22, %s3907_s23  }
  0x13   :  { %s3908_s26 = smov [#allocation2]   ;;  %s3909_s28 = smov [#allocation7]  }
  0x14   :  { %s17_s27 = sshll.u32 %s3908_s26, 4  ;;  %s38_s29 = sshll.u32 %s3909_s28, 4  ;;  %s18_s27 = int_to_ptr.vmem [resolvable:$true] %s17_s27  ;;  %s39_s29 = int_to_ptr.vmem [resolvable:$true] %s38_s29 }
  0x15   :  { %s3833_s5 = scalar_lea.hbm %s4440_s0, 128 }
  0x16   :  { %p3834_p8 = scmp.ne.s32.totalorder %s4440_s0, %s3833_s5  ;;  %p3837_p9 = scmp.lt.u32.totalorder %s3833_s5, %s4440_s0 }
  0x18   :  { %p3839_p10 = pnand %p3837_p9, %p3834_p8 }
  0x1a   :  { %3842 = shalt.err (!%p3839_p10)
}
  0x1b   :  { %s3843_s1 = scalar_lea.vmem %s18_s27, 128  ;;  %p3848_p12 = scmp.lt.s32.totalorder %s18_s27, %s18_s27 }
  0x1c   :  { %p3844_p11 = scmp.ne.s32.totalorder %s18_s27, %s3843_s1  ;;  %p3849_p13 = scmp.lt.s32.totalorder %s3843_s1, %s3843_s1 }
  0x1e   :  { %p3850_p0 = por %p3849_p13, %p3848_p12 }
  0x20   :  { %p3851_p1 = pnand %p3850_p0, %p3844_p11 }
  0x22   :  { %3854 = shalt.err (!%p3851_p1)
}
  0x23   :  { %20 = dma.hbm_to_vmem [thread:$0]  %s4440_s0, 128, %s18_s27, [#allocation3]  }
  0x24   :  { %s3855_s14 = scalar_lea.hbm %s4442_s2, 384 }
  0x25   :  { %p3856_p2 = scmp.ne.s32.totalorder %s4442_s2, %s3855_s14  ;;  %p3859_p3 = scmp.lt.u32.totalorder %s3855_s14, %s4442_s2 }
  0x27   :  { %p3861_p4 = pnand %p3859_p3, %p3856_p2 }
  0x29   :  { %3864 = shalt.err (!%p3861_p4)
}
  0x2a   :  { %s3865_s19 = scalar_lea.vmem %s39_s29, 384  ;;  %p3870_p6 = scmp.lt.s32.totalorder %s39_s29, %s39_s29 }
  0x2b   :  { %p3866_p5 = scmp.ne.s32.totalorder %s39_s29, %s3865_s19  ;;  %p3871_p7 = scmp.lt.s32.totalorder %s3865_s19, %s3865_s19 }
  0x2d   :  { %p3872_p8 = por %p3871_p7, %p3870_p6 }
  0x2f   :  { %p3873_p9 = pnand %p3872_p8, %p3866_p5 }
  0x31   :  { %3876 = shalt.err (!%p3873_p9)
}
  0x32   :  { %44 = dma.hbm_to_vmem [thread:$0]  %s4442_s2, 384, %s39_s29, [#allocation6], %s3906_s22, %s3906_s22, %s3907_s23  }
  0x33   :  { %3899 = dma.done.wait [#allocation3], 128  }
  0x34   :  { %3900 = vsyncadd [#allocation3], 4294967168 }
  0x35   :  { %3901 = dma.done.wait [#allocation6], 7040  }
  0x36   :  { %3902 = vsyncadd [#allocation6], 4294960256  ;;  %v3910_v0 = vmov 0.0|0.0   ;;  %vm3911_vm0 = vmmov 0   ;;  %v3912_v1 = vmov 0.0   ;;  %v57_v2 = vld [vmem:[#allocation5] sm:$0xff]  ;;  %v161_v48 = vlaneseq }
  0x37   :  { %3415 = vmatprep.subr.bf16.mxu0 %v3910_v0  ;;  %3185 = vmatprep.mubr.msk.f32.mxu0 %vm3911_vm0, %v3912_v1  ;;  %v58_v3 = vld [vmem:[#allocation5 + $0x8] sm:$0xff]  ;;  %v59_v4 = vld [vmem:[#allocation5 + $0x10] sm:$0xff]  ;;  %v60_v6 = vld [vmem:[#allocation5 + $0x18] sm:$0xff]  ;;  %vm66_vm1 = vcmask 523264   ;;  %vm155_vm2 = vcmask 1040384   ;;  %vm157_vm3 = vcmask 1044480  }
  0x38   :  { %v3416_v5 = vpack.c.bf16 %v58_v3, %v57_v2  ;;  %v3419_v7 = vpack.c.bf16 %v60_v6, %v59_v4  ;;  %v61_v8 = vld [vmem:[#allocation5 + $0x20] sm:$0xff]  ;;  %v62_v9 = vld [vmem:[#allocation5 + $0x28] sm:$0xff]  ;;  %v63_v11 = vld [vmem:[#allocation5 + $0x30] sm:$0xff]  ;;  %vm159_vm4 = vcmask 1045504   ;;  %vm196_vm5 = vcmask 261120   ;;  %s3913_s2 = smov 96  }
  0x39   :  { %v3422_v10 = vpack.c.bf16 %v62_v9, %v61_v8  ;;  %v64_v12 = vld [vmem:[#allocation5 + $0x38] sm:$0xff]  ;;  %v4000_v15 = vld [vmem:[#allocation7] sm:$0xff]  ;;  %vm200_vm6 = vcmask 254976   ;;  %v177_v41 = vld [vmem:[#allocation5 + $0x48] sm:$0xff]  ;;  %v4020_v52 = vshrl.u32 %v161_v48, 7  ;;  %vm332_vm7 = vcmask 64512  }
  0x3a   :  { %3417 = vmatpush3.bf16.msra.mxu0 %v3416_v5  ;;  %v3425_v13 = vpack.c.bf16 %v64_v12, %v63_v11  ;;  %v65_v14 = vld [vmem:[#allocation2] sm:$0xff]  ;;  %v141_v16 = vrot.slane %v4000_v15, 1  ;;  %v144_v17 = vrot.slane %v4000_v15, 5  ;;  %v150_v22 = vrot.slane %v4000_v15, 3  ;;  %v176_v40 = vld [vmem:[#allocation5 + $0x40] sm:$0xff]  ;;  %v178_v42 = vld [vmem:[#allocation5 + $0x50] sm:$0xff] }
  0x3b   :  { %3418 = vmatprep.subr.bf16.mxu0 %v3910_v0  ;;  %v3427_v43 = vpack.c.bf16 %v177_v41, %v176_v40  ;;  %v179_v44 = vld [vmem:[#allocation5 + $0x58] sm:$0xff]  ;;  %v4023_v54 = vsub.s32 5, %v4020_v52  ;;  %v233_v55 = vsub.s32 6, %v4020_v52  ;;  %v320_v4 = vsub.s32 7, %v4020_v52  ;;  %s3914_s21 = smov 88   ;;  %s3915_s22 = smov 120   ;;  %vm4055_vm8 = vmpackc.low %vm332_vm7, %vm332_vm7 }
  0x3c   :  { %v3431_v45 = vpack.c.bf16 %v179_v44, %v178_v42  ;;  %vm166_vm10 = vcmp.ge.s32.totalorder %v4020_v52, 5  ;;  %vm418_vm12 = vcmask 80896   ;;  %vm422_vm13 = vcmask 74752   ;;  %s3918_s24 = smov 64   ;;  %s3920_s25 = smov 56  }
  0x3d   :  { %3428 = vmatprep.subr.bf16.mxu1 %v3427_v43  ;;  %v228_v56 = vrot.slane %v4000_v15, %v4023_v54  ;;  %v234_v59 = vrot.slane %v4000_v15, %v233_v55  ;;  %v321_v5 = vrot.slane %v4000_v15, %v320_v4  ;;  %vm453_vm14 = vcmask 1041408   ;;  %s3921_s26 = smov 112   ;;  %s3922_s27 = smov 80  }
  0x3e   :  { %3420 = vmatpush3.bf16.msra.mxu0 %v3419_v7  ;;  %3430 = vmatpush3.bf16.msra.mxu1 %v3427_v43  ;;  %vm3919_vm15 = vmmov 1   ;;  %s3923_s28 = smov 48   ;;  %s3924_s29 = smov 104  }
  0x3f   :  { %3421 = vmatprep.subr.bf16.mxu0 %v3910_v0  ;;  %3432 = vmatprep.subr.bf16.mxu1 %v3431_v45  ;;  %s3925_s30 = smov 72   ;;  %s3926_s4 = smov 40  }
  0x40   :  { %s3927_s5 = smov 16   ;;  %s3928_s6 = smov 24  }
  0x42   :  { %3423 = vmatpush3.bf16.msra.mxu0 %v3422_v10  ;;  %3434 = vmatpush3.bf16.msra.mxu1 %v3431_v45 }
  0x43   :  { %3424 = vmatprep.subr.bf16.mxu0 %v3910_v0 }
  0x46   :  { %3426 = vmatpush3.bf16.msra.mxu0 %v3425_v13 }
  0x49   :  { %3186 = vmatmul.mubr.msk.f32.vlgmr.msra.gmra.mrb[0].mxu0 %vm66_vm1, %v65_v14 }
 0x11c   :  { %v136_v18 = vpop.f32.mrb[0].mxu0 }
 0x11d   :  { %v143_v19 = vadd.f32 %v141_v16, %v136_v18  ;;  %v146_v20 = vadd.f32 %v144_v17, %v136_v18  ;;  %v3187_v21 = vpop.f32.mrb[1].mxu0  ;;  %v165_v18 = vand.u32 127, %v161_v48 }
 0x11f   :  { %v148_v23 = vrot.slane %v143_v19, 7  ;;  %v4005_v24 = vrot.slane %v146_v20, 6  ;;  %vm170_vm9 = vcmp.ge.s32.totalorder %v165_v18, 5  ;;  %v3916_v19 = vmov 0  }
 0x120   :  { %v168_v20 = vsel %vm166_vm10, 1, %v3916_v19  ;;  %v171_v21 = vsel %vm170_vm9, 1, %v3916_v19 }
 0x121   :  { %v156_v25 = vsel %vm155_vm2, %v4000_v15, %v148_v23  ;;  %v201_v29 = vsel %vm200_vm6, %v4005_v24, 0.0  ;;  %vm172_vm11 = vcmp.eq.s32.totalorder %v168_v20, %v171_v21 }
 0x122   :  { %v158_v26 = vsel %vm157_vm3, %v156_v25, %v150_v22  ;;  %v3917_v22 = vmov -1e+30   ;;  %vm4078_vm3 = vmpackc.low %vm453_vm14, %vm3919_vm15 }
 0x123   :  { %v4010_v27 = vsel %vm159_vm4, %v158_v26, %v4005_v24  ;;  %v4066_v23 = vsel %vm172_vm11, 0.0, %v3917_v22  ;;  %v4068_v26 = vsel %vm170_vm9, 0.0, %v3917_v22  ;;  %vm1160_vm4 = vcmask 130048  }
 0x124   :  { %v197_v28 = vsel %vm196_vm5, %v4010_v27, 0.0  ;;  %vm1163_vm9 = vcmask 195584  }
 0x125   :  { %198 = vadd.xlane.f32.xlu0 %v197_v28 }
 0x129   :  { %202 = vadd.xlane.f32.xlu0 %v201_v29 }
 0x1b2   :  { %v199_v30 = vpop.xlane.xlu0 %198 }
 0x1b3   :  { %v205_v31 = vmul.f32 0.03125, %v199_v30 }
 0x1b5   :  { %v207_v32 = vsub.f32 %v4010_v27, %v205_v31 }
 0x1b6   :  { %v203_v33 = vpop.xlane.xlu0 %202 }
 0x1b7   :  { %v206_v34 = vmul.f32 0.03125, %v203_v33  ;;  %v209_v35 = vmul.f32 %v207_v32, %v207_v32 }
 0x1b9   :  { %v208_v36 = vsub.f32 %v4005_v24, %v206_v34  ;;  %v211_v37 = vsel %vm196_vm5, %v209_v35, 0.0 }
 0x1ba   :  { %212 = vadd.xlane.f32.xlu1 %v211_v37 }
 0x1bb   :  { %v210_v38 = vmul.f32 %v208_v36, %v208_v36 }
 0x1bd   :  { %v214_v39 = vsel %vm200_vm6, %v210_v38, 0.0 }
 0x1be   :  { %215 = vadd.xlane.f32.xlu1 %v214_v39 }
 0x247   :  { %v213_v46 = vpop.xlane.xlu1 %212 }
 0x248   :  { %v217_v47 = vmul.f32 0.03125, %v213_v46 }
 0x24a   :  { %v219_v49 = vadd.f32 1e-05, %v217_v47 }
 0x24b   :  { %v216_v50 = vpop.xlane.xlu1 %215 }
 0x24c   :  { %3715 = vrsqrt.f32 %v219_v49  ;;  %v218_v51 = vmul.f32 0.03125, %v216_v50 }
 0x24e   :  { %v220_v53 = vadd.f32 1e-05, %v218_v51 }
 0x250   :  { %3717 = vrsqrt.f32 %v220_v53 }
 0x256   :  { %v3716_v57 = vpop.eup %3715 }
 0x257   :  { %v223_v58 = vmul.f32 %v3716_v57, %v207_v32 }
 0x259   :  { %v229_v60 = vmul.f32 %v228_v56, %v223_v58 }
 0x25a   :  { %v3718_v61 = vpop.eup %3717 }
 0x25b   :  { %v224_v62 = vmul.f32 %v3718_v61, %v208_v36  ;;  %v235_v63 = vadd.f32 %v234_v59, %v229_v60 }
 0x25d   :  { %v230_v2 = vmul.f32 %v228_v56, %v224_v62  ;;  %3196 = vmatprep.mubr.msk.f32.mxu1 %vm196_vm5, %v235_v63 }
 0x25f   :  { %v236_v3 = vadd.f32 %v234_v59, %v230_v2 }
 0x261   :  { %3197 = vmatmul.mubr.msk.f32.vlgmr.msra.gmra.mrb[0].mxu1 %vm196_vm5, %v236_v3 }
 0x334   :  { %v3198_v6 = vpop.f32.mrb[0].mxu1 }
 0x335   :  { %v323_v7 = vadd.f32 %v3198_v6, %v321_v5  ;;  %v309_v8 = vpop.f32.mrb[1].mxu1 }
 0x336   :  { %v322_v9 = vadd.f32 %v321_v5, %v309_v8 }
 0x337   :  { %v4049_v12 = vmul.f32 0.35355338, %v323_v7 }
 0x338   :  { %v4037_v10 = vpack.i.bf16 %v323_v7, %v322_v9  ;;  %v4039_v11 = vmul.f32 0.35355338, %v322_v9 }
 0x33a   :  { %3636 = vrot.lane.b32.xlu0 %v4037_v10, %s3913_s2  ;;  %3203 = vmatprep.mubr.msk.f32.mxu1 %vm332_vm7, %v4039_v11 }
 0x33e   :  { %3646 = vrot.lane.b32.xlu0 %v4037_v10, %s3914_s21 }
 0x342   :  { %531 = vrot.lane.b32.xlu0 %v4039_v11, %s3915_s22 }
 0x346   :  { %533 = vrot.lane.b32.xlu0 %v4049_v12, %s3915_s22 }
 0x3ac   :  { %v3637_v13 = vpop.permute.xlu0 %3636 }
 0x3ad   :  { %v3639_v14 = vunpack.i.h.bf16 %v3637_v13  ;;  %v3638_v15 = vunpack.i.l.bf16 %v3637_v13 }
 0x3af   :  { %v3435_v17 = vpack.c.bf16 %v3639_v14, %v3638_v15 }
 0x3b0   :  { %v3647_v45 = vpop.permute.xlu0 %3646 }
 0x3b1   :  { %3437 = vmatprep.subr.msk.bf16.mxu1 %vm4055_vm8, %v3435_v17  ;;  %v3649_v47 = vunpack.i.h.bf16 %v3647_v45  ;;  %v3648_v48 = vunpack.i.l.bf16 %v3647_v45 }
 0x3b2   :  { %3440 = vmatpush3.bf16.xpose.msk.msra.mxu1 %vm4055_vm8, %v3435_v17 }
 0x3b3   :  { %v3447_v56 = vpack.c.bf16 %v3649_v47, %v3648_v48 }
 0x3b4   :  { %v532_v61 = vpop.permute.xlu0 %531 }
 0x3b8   :  { %v534_v62 = vpop.permute.xlu0 %533 }
 0x3b9   :  { %3204 = vmatmul.mubr.msk.f32.vlgmr.msra.gmra.mrb[2].mxu1 %vm332_vm7, %v4049_v12 }
 0x48c   :  { %v3205_v25 = vpop.f32.mrb[2].mxu1 }
 0x48d   :  { %v409_v28 = vpop.f32.mrb[3].mxu1  ;;  %v415_v30 = vadd.f32 %v3205_v25, %v4068_v26 }
 0x48e   :  { %v410_v29 = vadd.f32 %v409_v28, %v4066_v23 }
 0x48f   :  { %v423_v32 = vsel %vm422_vm13, %v415_v30, -inf }
 0x490   :  { %v419_v31 = vsel %vm418_vm12, %v410_v29, -inf }
 0x491   :  { %420 = vmax.xlane.f32.xlu1 %v419_v31 }
 0x495   :  { %424 = vmax.xlane.f32.xlu1 %v423_v32 }
 0x51e   :  { %v421_v33 = vpop.xlane.xlu1 %420 }
 0x51f   :  { %v426_v34 = vsub.f32 %v410_v29, %v421_v33 }
 0x521   :  { %v428_v37 = vmul.f32 1.442695, %v426_v34 }
 0x522   :  { %v425_v35 = vpop.xlane.xlu1 %424 }
 0x523   :  { %v427_v36 = vsub.f32 %v415_v30, %v425_v35 }
 0x525   :  { %v430_v38 = vmul.f32 1.442695, %v427_v36 }
 0x527   :  { %3719 = vpow2.f32 %v430_v38 }
 0x528   :  { %3721 = vpow2.f32 %v428_v37 }
 0x531   :  { %v3720_v39 = vpop.eup %3719 }
 0x532   :  { %v435_v40 = vsel %vm422_vm13, %v3720_v39, 0.0  ;;  %v3722_v41 = vpop.eup %3721 }
 0x533   :  { %436 = vadd.xlane.f32.xlu1 %v435_v40  ;;  %v432_v42 = vsel %vm418_vm12, %v3722_v41, 0.0 }
 0x537   :  { %433 = vadd.xlane.f32.xlu1 %v432_v42 }
 0x548   :  { %3641 = vrot.lane.b32.xlu1 %v4037_v10, %s3918_s24 }
 0x5c0   :  { %v437_v43 = vpop.xlane.xlu1 %436 }
 0x5c1   :  { %3723 = vrcp.f32 %v437_v43 }
 0x5c4   :  { %v434_v44 = vpop.xlane.xlu1 %433 }
 0x5c5   :  { %3725 = vrcp.f32 %v434_v44 }
 0x5c8   :  { %v3642_v46 = vpop.permute.xlu1 %3641 }
 0x5c9   :  { %v3644_v49 = vunpack.i.h.bf16 %v3642_v46  ;;  %v3643_v50 = vunpack.i.l.bf16 %v3642_v46 }
 0x5cb   :  { %v3441_v53 = vpack.c.bf16 %v3644_v49, %v3643_v50  ;;  %v3724_v57 = vpop.eup %3723 }
 0x5cc   :  { %v441_v60 = vmul.f32 %v3724_v57, %v3720_v39 }
 0x5cd   :  { %3443 = vmatprep.subr.msk.bf16.mxu1 %vm4078_vm3, %v3441_v53 }
 0x5ce   :  { %3446 = vmatpush3.bf16.msk.msra.mxu1 %vm4078_vm3, %v3441_v53 }
 0x5cf   :  { %v3726_v58 = vpop.eup %3725  ;;  %3449 = vmatprep.subr.msk.bf16.mxu1 %vm4055_vm8, %v3447_v56 }
 0x5d0   :  { %v440_v59 = vmul.f32 %v3726_v58, %v3722_v41 }
 0x5d2   :  { %3210 = vmatprep.mubr.msk.f32.mxu1 %vm418_vm12, %v440_v59 }
 0x5d3   :  { %3211 = vmatmul.mubr.msk.f32.vlgmr.msra.gmra.mrb[4].mxu1 %vm418_vm12, %v441_v60 }
 0x5d4   :  { %3217 = vmatprep.mubr.msk.f32.mxu1 %vm332_vm7, %v532_v61 }
 0x5d7   :  { %3452 = vmatpush3.bf16.xpose.msk.msra.mxu1 %vm4055_vm8, %v3447_v56 }
 0x5de   :  { %3218 = vmatmul.mubr.msk.f32.vlgmr.msra.gmra.mrb[6].mxu1 %vm332_vm7, %v534_v62 }
 0x6a6   :  { %v4094_v63 = vpop.f32.mrb[4].mxu1 }
 0x6a7   :  { %v4096_v2 = vpop.f32.mrb[5].mxu1 }
 0x6b1   :  { %v3219_v3 = vpop.f32.mrb[6].mxu1 }
 0x6b2   :  { %v619_v5 = vadd.f32 %v3219_v3, %v4068_v26  ;;  %v613_v6 = vpop.f32.mrb[7].mxu1 }
 0x6b3   :  { %v614_v7 = vadd.f32 %v613_v6, %v4066_v23 }
 0x6b4   :  { %v625_v8 = vsel %vm422_vm13, %v619_v5, -inf }
 0x6b5   :  { %626 = vmax.xlane.f32.xlu0 %v625_v8  ;;  %v622_v9 = vsel %vm418_vm12, %v614_v7, -inf }
 0x6b6   :  { %623 = vmax.xlane.f32.xlu1 %v622_v9 }
 0x6c7   :  { %3651 = vrot.lane.b32.xlu1 %v4037_v10, %s3920_s25 }
 0x6cb   :  { %732 = vrot.lane.b32.xlu1 %v4039_v11, %s3921_s26 }
 0x6cf   :  { %734 = vrot.lane.b32.xlu1 %v4049_v12, %s3921_s26 }
 0x742   :  { %v627_v13 = vpop.xlane.xlu0 %626 }
 0x743   :  { %v629_v14 = vsub.f32 %v619_v5, %v627_v13  ;;  %v624_v15 = vpop.xlane.xlu1 %623 }
 0x744   :  { %v628_v17 = vsub.f32 %v614_v7, %v624_v15 }
 0x745   :  { %v632_v18 = vmul.f32 1.442695, %v629_v14 }
 0x746   :  { %v630_v19 = vmul.f32 1.442695, %v628_v17 }
 0x747   :  { %3727 = vpow2.f32 %v632_v18  ;;  %v3652_v20 = vpop.permute.xlu1 %3651 }
 0x748   :  { %v3654_v21 = vunpack.i.h.bf16 %v3652_v20  ;;  %v3653_v22 = vunpack.i.l.bf16 %v3652_v20  ;;  %3729 = vpow2.f32 %v630_v19 }
 0x74a   :  { %v3453_v25 = vpack.c.bf16 %v3654_v21, %v3653_v22 }
 0x74b   :  { %v733_v42 = vpop.permute.xlu1 %732 }
 0x74c   :  { %3455 = vmatprep.subr.msk.bf16.mxu0 %vm4078_vm3, %v3453_v25 }
 0x74d   :  { %3458 = vmatpush3.bf16.msk.msra.mxu0 %vm4078_vm3, %v3453_v25 }
 0x74f   :  { %v735_v43 = vpop.permute.xlu1 %734 }
 0x751   :  { %v3728_v28 = vpop.eup %3727 }
 0x752   :  { %v637_v29 = vsel %vm422_vm13, %v3728_v28, 0.0  ;;  %v3730_v30 = vpop.eup %3729 }
 0x753   :  { %638 = vadd.xlane.f32.xlu0 %v637_v29  ;;  %v634_v31 = vsel %vm418_vm12, %v3730_v30, 0.0 }
 0x757   :  { %635 = vadd.xlane.f32.xlu0 %v634_v31 }
 0x76d   :  { %3656 = vrot.lane.b32.xlu0 %v4037_v10, %s3922_s27 }
 0x7e0   :  { %v639_v32 = vpop.xlane.xlu0 %638 }
 0x7e1   :  { %3731 = vrcp.f32 %v639_v32 }
 0x7e4   :  { %v636_v33 = vpop.xlane.xlu0 %635 }
 0x7e5   :  { %3733 = vrcp.f32 %v636_v33 }
 0x7e8   :  { %v3657_v34 = vpop.permute.xlu0 %3656 }
 0x7e9   :  { %v3659_v35 = vunpack.i.h.bf16 %v3657_v34  ;;  %v3658_v36 = vunpack.i.l.bf16 %v3657_v34 }
 0x7eb   :  { %v3459_v37 = vpack.c.bf16 %v3659_v35, %v3658_v36  ;;  %v3732_v38 = vpop.eup %3731 }
 0x7ec   :  { %v643_v41 = vmul.f32 %v3732_v38, %v3728_v28 }
 0x7ed   :  { %3461 = vmatprep.subr.msk.bf16.mxu0 %vm4055_vm8, %v3459_v37 }
 0x7ef   :  { %v3734_v39 = vpop.eup %3733 }
 0x7f0   :  { %v642_v40 = vmul.f32 %v3734_v39, %v3730_v30 }
 0x7f2   :  { %3224 = vmatprep.mubr.msk.f32.mxu0 %vm418_vm12, %v642_v40 }
 0x7f3   :  { %3225 = vmatmul.mubr.msk.f32.vlgmr.msra.gmra.mrb[2].mxu0 %vm418_vm12, %v643_v41 }
 0x7f4   :  { %3464 = vmatpush3.bf16.xpose.msk.msra.mxu0 %vm4055_vm8, %v3459_v37  ;;  %3231 = vmatprep.mubr.msk.f32.mxu0 %vm332_vm7, %v733_v42 }
 0x7fb   :  { %3232 = vmatmul.mubr.msk.f32.vlgmr.msra.gmra.mrb[4].mxu0 %vm332_vm7, %v735_v43 }
 0x8c6   :  { %v4124_v44 = vpop.f32.mrb[2].mxu0 }
 0x8c7   :  { %v4126_v45 = vpop.f32.mrb[3].mxu0 }
 0x8ce   :  { %v3233_v46 = vpop.f32.mrb[4].mxu0 }
 0x8cf   :  { %v820_v47 = vadd.f32 %v3233_v46, %v4068_v26  ;;  %v814_v48 = vpop.f32.mrb[5].mxu0 }
 0x8d0   :  { %v815_v49 = vadd.f32 %v814_v48, %v4066_v23 }
 0x8d1   :  { %v826_v50 = vsel %vm422_vm13, %v820_v47, -inf }
 0x8d2   :  { %827 = vmax.xlane.f32.xlu0 %v826_v50  ;;  %v823_v53 = vsel %vm418_vm12, %v815_v49, -inf }
 0x8d3   :  { %824 = vmax.xlane.f32.xlu1 %v823_v53 }
 0x8e4   :  { %3661 = vrot.lane.b32.xlu1 %v4037_v10, %s3923_s28 }
 0x8e8   :  { %933 = vrot.lane.b32.xlu1 %v4039_v11, %s3924_s29 }
 0x8ec   :  { %935 = vrot.lane.b32.xlu1 %v4049_v12, %s3924_s29 }
 0x95f   :  { %v828_v56 = vpop.xlane.xlu0 %827 }
 0x960   :  { %v830_v57 = vsub.f32 %v820_v47, %v828_v56  ;;  %v825_v58 = vpop.xlane.xlu1 %824 }
 0x961   :  { %v829_v59 = vsub.f32 %v815_v49, %v825_v58 }
 0x962   :  { %v833_v60 = vmul.f32 1.442695, %v830_v57 }
 0x963   :  { %v831_v61 = vmul.f32 1.442695, %v829_v59 }
 0x964   :  { %3735 = vpow2.f32 %v833_v60  ;;  %v3662_v62 = vpop.permute.xlu1 %3661 }
 0x965   :  { %v3664_v3 = vunpack.i.h.bf16 %v3662_v62  ;;  %v3663_v5 = vunpack.i.l.bf16 %v3662_v62  ;;  %3737 = vpow2.f32 %v831_v61  ;;  %v180_v61 = vld [vmem:[#allocation5 + $0x60] sm:$0xff]  ;;  %v181_v62 = vld [vmem:[#allocation5 + $0x68] sm:$0xff] }
 0x967   :  { %v3465_v6 = vpack.c.bf16 %v3664_v3, %v3663_v5  ;;  %v182_v3 = vld [vmem:[#allocation5 + $0x70] sm:$0xff]  ;;  %v3483_v5 = vpack.c.bf16 %v181_v62, %v180_v61  ;;  %v1289_v61 = vsub.s32 2, %v4020_v52 }
 0x968   :  { %v934_v25 = vpop.permute.xlu1 %933 }
 0x969   :  { %3467 = vmatprep.subr.msk.bf16.mxu1 %vm4078_vm3, %v3465_v6 }
 0x96a   :  { %3470 = vmatpush3.bf16.msk.msra.mxu1 %vm4078_vm3, %v3465_v6  ;;  %v183_v6 = vld [vmem:[#allocation5 + $0x78] sm:$0xff] }
 0x96c   :  { %v936_v28 = vpop.permute.xlu1 %935 }
 0x96e   :  { %v3736_v11 = vpop.eup %3735 }
 0x96f   :  { %v838_v12 = vsel %vm422_vm13, %v3736_v11, 0.0  ;;  %v3738_v7 = vpop.eup %3737 }
 0x970   :  { %839 = vadd.xlane.f32.xlu0 %v838_v12  ;;  %v835_v8 = vsel %vm418_vm12, %v3738_v7, 0.0 }
 0x974   :  { %836 = vadd.xlane.f32.xlu0 %v835_v8 }
 0x98a   :  { %3666 = vrot.lane.b32.xlu0 %v4037_v10, %s3925_s30 }
 0x9fd   :  { %v840_v9 = vpop.xlane.xlu0 %839 }
 0x9fe   :  { %3739 = vrcp.f32 %v840_v9 }
 0xa01   :  { %v837_v13 = vpop.xlane.xlu0 %836 }
 0xa02   :  { %3741 = vrcp.f32 %v837_v13 }
 0xa05   :  { %v3667_v14 = vpop.permute.xlu0 %3666 }
 0xa06   :  { %v3669_v15 = vunpack.i.h.bf16 %v3667_v14  ;;  %v3668_v17 = vunpack.i.l.bf16 %v3667_v14 }
 0xa08   :  { %v3471_v18 = vpack.c.bf16 %v3669_v15, %v3668_v17  ;;  %v3740_v19 = vpop.eup %3739 }
 0xa09   :  { %v844_v22 = vmul.f32 %v3740_v19, %v3736_v11  ;;  %v3487_v11 = vpack.c.bf16 %v183_v6, %v182_v3 }
 0xa0a   :  { %3473 = vmatprep.subr.msk.bf16.mxu1 %vm4055_vm8, %v3471_v18 }
 0xa0c   :  { %v3742_v20 = vpop.eup %3741 }
 0xa0d   :  { %v843_v21 = vmul.f32 %v3742_v20, %v3738_v7 }
 0xa0f   :  { %3238 = vmatprep.mubr.msk.f32.mxu1 %vm418_vm12, %v843_v21 }
 0xa10   :  { %3239 = vmatmul.mubr.msk.f32.vlgmr.msra.gmra.mrb[8].mxu1 %vm418_vm12, %v844_v22 }
 0xa11   :  { %3476 = vmatpush3.bf16.xpose.msk.msra.mxu1 %vm4055_vm8, %v3471_v18  ;;  %3245 = vmatprep.mubr.msk.f32.mxu1 %vm332_vm7, %v934_v25  ;;  %v4187_v25 = vld [vmem:[#allocation7 + $0x8] sm:$0xff] }
 0xa12   :  { %v1290_v6 = vrot.slane %v4187_v25, %v1289_v61 }
 0xa18   :  { %3246 = vmatmul.mubr.msk.f32.vlgmr.msra.gmra.mrb[10].mxu1 %vm332_vm7, %v936_v28 }
 0xae3   :  { %v3240_v29 = vpop.f32.mrb[8].mxu1 }
 0xae4   :  { %v924_v30 = vpop.f32.mrb[9].mxu1 }
 0xaeb   :  { %v3247_v31 = vpop.f32.mrb[10].mxu1 }
 0xaec   :  { %v1021_v32 = vadd.f32 %v3247_v31, %v4068_v26  ;;  %v1015_v33 = vpop.f32.mrb[11].mxu1 }
 0xaed   :  { %v1016_v34 = vadd.f32 %v1015_v33, %v4066_v23 }
 0xaee   :  { %v1027_v35 = vsel %vm422_vm13, %v1021_v32, -inf }
 0xaef   :  { %1028 = vmax.xlane.f32.xlu0 %v1027_v35  ;;  %v1024_v36 = vsel %vm418_vm12, %v1016_v34, -inf }
 0xaf0   :  { %1025 = vmax.xlane.f32.xlu1 %v1024_v36 }
 0xb01   :  { %3671 = vrot.lane.b32.xlu1 %v4037_v10, %s3926_s4 }
 0xb05   :  { %1138 = vrot.lane.b32.xlu1 %v4124_v44, %s3907_s23 }
 0xb09   :  { %1144 = vrot.lane.b32.xlu1 %v924_v30, %s3927_s5 }
 0xb0d   :  { %1146 = vrot.lane.b32.xlu1 %v3240_v29, %s3927_s5 }
 0xb7c   :  { %v1029_v37 = vpop.xlane.xlu0 %1028 }
 0xb7d   :  { %v1031_v38 = vsub.f32 %v1021_v32, %v1029_v37  ;;  %v1026_v39 = vpop.xlane.xlu1 %1025 }
 0xb7e   :  { %v1030_v40 = vsub.f32 %v1016_v34, %v1026_v39 }
 0xb7f   :  { %v1034_v41 = vmul.f32 1.442695, %v1031_v38 }
 0xb80   :  { %v1032_v42 = vmul.f32 1.442695, %v1030_v40 }
 0xb81   :  { %v3672_v43 = vpop.permute.xlu1 %3671 }
 0xb82   :  { %3743 = vpow2.f32 %v1032_v42  ;;  %v3674_v46 = vunpack.i.h.bf16 %v3672_v43  ;;  %v3673_v47 = vunpack.i.l.bf16 %v3672_v43 }
 0xb83   :  { %3745 = vpow2.f32 %v1034_v41 }
 0xb84   :  { %v3477_v10 = vpack.c.bf16 %v3674_v46, %v3673_v47  ;;  %v184_v46 = vld [vmem:[#allocation5 + $0x80] sm:$0xff]  ;;  %v185_v47 = vld [vmem:[#allocation5 + $0x88] sm:$0xff] }
 0xb85   :  { %v1139_v7 = vpop.permute.xlu1 %1138 }
 0xb86   :  { %3479 = vmatprep.subr.msk.bf16.mxu0 %vm4078_vm3, %v3477_v10  ;;  %v1159_v17 = vsel %vm332_vm7, %v4094_v63, %v1139_v7 }
 0xb87   :  { %3482 = vmatpush3.bf16.msk.msra.mxu0 %vm4078_vm3, %v3477_v10  ;;  %v3491_v10 = vpack.c.bf16 %v185_v47, %v184_v46 }
 0xb88   :  { %3484 = vmatprep.subr.bf16.mxu0 %v3483_v5 }
 0xb89   :  { %v1145_v8 = vpop.permute.xlu1 %1144  ;;  %3492 = vmatprep.subr.bf16.mxu1 %v3491_v10 }
 0xb8a   :  { %3494 = vmatpush3.bf16.msra.mxu1 %v3491_v10 }
 0xb8c   :  { %v3744_v44 = vpop.eup %3743 }
 0xb8d   :  { %v1036_v48 = vsel %vm418_vm12, %v3744_v44, 0.0  ;;  %v3746_v49 = vpop.eup %3745  ;;  %v1147_v13 = vpop.permute.xlu1 %1146 }
 0xb8e   :  { %1037 = vadd.xlane.f32.xlu0 %v1036_v48  ;;  %v1039_v50 = vsel %vm422_vm13, %v3746_v49, 0.0  ;;  %v1162_v20 = vsel %vm1160_vm4, %v1159_v17, %v1147_v13  ;;  %v187_v48 = vld [vmem:[#allocation5 + $0x98] sm:$0xff]  ;;  %v188_v13 = vld [vmem:[#allocation5 + $0xa0] sm:$0xff]  ;;  %v190_v17 = vld [vmem:[#allocation5 + $0xb0] sm:$0xff] }
 0xb92   :  { %1040 = vadd.xlane.f32.xlu0 %v1039_v50 }
 0xba8   :  { %1136 = vrot.lane.b32.xlu0 %v4126_v45, %s3907_s23 }
 0xc1b   :  { %v1038_v53 = vpop.xlane.xlu0 %1037 }
 0xc1c   :  { %3747 = vrcp.f32 %v1038_v53 }
 0xc1f   :  { %v1041_v56 = vpop.xlane.xlu0 %1040 }
 0xc20   :  { %3749 = vrcp.f32 %v1041_v56 }
 0xc23   :  { %v1137_v9 = vpop.permute.xlu0 %1136 }
 0xc24   :  { %v1158_v14 = vsel %vm332_vm7, %v4096_v2, %v1137_v9  ;;  %v1249_v2 = vsub.s32 0, %v4020_v52 }
 0xc25   :  { %v1161_v18 = vsel %vm1160_vm4, %v1158_v14, %v1145_v8  ;;  %v189_v14 = vld [vmem:[#allocation5 + $0xa8] sm:$0xff] }
 0xc26   :  { %v3748_v57 = vpop.eup %3747  ;;  %v1250_v63 = vrot.slane %v4187_v25, %v1249_v2 }
 0xc27   :  { %v1044_v58 = vmul.f32 %v3748_v57, %v3744_v44  ;;  %v186_v44 = vld [vmem:[#allocation5 + $0x90] sm:$0xff] }
 0xc29   :  { %3252 = vmatprep.mubr.msk.f32.mxu0 %vm418_vm12, %v1044_v58 }
 0xc2a   :  { %v3750_v59 = vpop.eup %3749 }
 0xc2b   :  { %v1045_v60 = vmul.f32 %v3750_v59, %v3746_v49  ;;  %v3495_v49 = vpack.c.bf16 %v187_v48, %v186_v44 }
 0xc2d   :  { %3253 = vmatmul.mubr.msk.f32.vlgmr.msra.gmra.mrb[6].mxu0 %vm418_vm12, %v1045_v60  ;;  %3496 = vmatprep.subr.bf16.mxu1 %v3495_v49  ;;  %v1283_v60 = vsub.s32 1, %v4020_v52 }
 0xc2e   :  { %3486 = vmatpush3.bf16.msra.mxu0 %v3483_v5  ;;  %3498 = vmatpush3.bf16.msra.mxu1 %v3495_v49 }
 0xc2f   :  { %3488 = vmatprep.subr.bf16.mxu0 %v3487_v11  ;;  %v1284_v62 = vrot.slane %v4187_v25, %v1283_v60 }
 0xc32   :  { %3490 = vmatpush3.bf16.msra.mxu0 %v3487_v11 }
 0xd00   :  { %v3254_v45 = vpop.f32.mrb[6].mxu0 }
 0xd01   :  { %1154 = vrot.lane.b32.xlu1 %v3254_v45, %s3928_s6  ;;  %v1125_v12 = vpop.f32.mrb[7].mxu0 }
 0xd02   :  { %1152 = vrot.lane.b32.xlu0 %v1125_v12, %s3928_s6 }
 0xd73   :  { %v1155_v15 = vpop.permute.xlu1 %1154 }
 0xd74   :  { %v1153_v19 = vpop.permute.xlu0 %1152  ;;  %v1165_v22 = vsel %vm1163_vm9, %v1162_v20, %v1155_v15  ;;  %v3499_v15 = vpack.c.bf16 %v189_v14, %v188_v13  ;;  %v192_v20 = vld [vmem:[#allocation5 + $0xc0] sm:$0xff] }
 0xd75   :  { %v1164_v21 = vsel %vm1163_vm9, %v1161_v18, %v1153_v19  ;;  %v191_v18 = vld [vmem:[#allocation5 + $0xb8] sm:$0xff] }
 0xd76   :  { %3263 = vmatprep.mubr.msk.f32.mxu0 %vm196_vm5, %v1164_v21  ;;  %3500 = vmatprep.subr.bf16.mxu0 %v3499_v15  ;;  %v3503_v19 = vpack.c.bf16 %v191_v18, %v190_v17  ;;  %v193_v21 = vld [vmem:[#allocation5 + $0xc8] sm:$0xff] }
 0xd77   :  { %3264 = vmatmul.mubr.msk.f32.vlgmr.msra.gmra.mrb[8].mxu0 %vm196_vm5, %v1165_v22  ;;  %v3507_v22 = vpack.c.bf16 %v193_v21, %v192_v20 }
 0xd78   :  { %3502 = vmatpush3.bf16.msra.mxu0 %v3499_v15 }
 0xd79   :  { %3504 = vmatprep.subr.bf16.mxu0 %v3503_v19 }
 0xd7c   :  { %3506 = vmatpush3.bf16.msra.mxu0 %v3503_v19 }
 0xd7d   :  { %3508 = vmatprep.subr.bf16.mxu0 %v3507_v22 }
 0xd80   :  { %3510 = vmatpush3.bf16.msra.mxu0 %v3507_v22 }
 0xe4a   :  { %v3265_v28 = vpop.f32.mrb[8].mxu0 }
 0xe4b   :  { %v1252_v29 = vadd.f32 %v3265_v28, %v1250_v63  ;;  %v1238_v30 = vpop.f32.mrb[9].mxu0  ;;  %v195_v28 = vld [vmem:[#allocation5 + $0xd8] sm:$0xff] }
 0xe4c   :  { %v1251_v31 = vadd.f32 %v1250_v63, %v1238_v30  ;;  %v194_v63 = vld [vmem:[#allocation5 + $0xd0] sm:$0xff]  ;;  %v1376_v30 = vsub.s32 3, %v4020_v52 }
 0xe4d   :  { %v4193_v32 = vadd.f32 %v1252_v29, %v4005_v24  ;;  %v3511_v29 = vpack.c.bf16 %v195_v28, %v194_v63  ;;  %v3929_v63 = vmov -1.0  }
 0xe4e   :  { %v4196_v33 = vadd.f32 %v1251_v31, %v4010_v27  ;;  %v1377_v31 = vrot.slane %v4187_v25, %v1376_v30 }
 0xe4f   :  { %v1258_v34 = vsel %vm200_vm6, %v4193_v32, 0.0  ;;  %3512 = vmatprep.subr.bf16.mxu0 %v3511_v29 }
 0xe50   :  { %1259 = vadd.xlane.f32.xlu1 %v1258_v34  ;;  %v1255_v35 = vsel %vm196_vm5, %v4196_v33, 0.0  ;;  %3514 = vmatpush3.bf16.msra.mxu0 %v3511_v29 }
 0xe51   :  { %1256 = vadd.xlane.f32.xlu0 %v1255_v35 }
 0xedd   :  { %v1260_v36 = vpop.xlane.xlu1 %1259 }
 0xede   :  { %v1262_v37 = vmul.f32 0.03125, %v1260_v36  ;;  %v1257_v38 = vpop.xlane.xlu0 %1256 }
 0xedf   :  { %v1261_v39 = vmul.f32 0.03125, %v1257_v38 }
 0xee0   :  { %v1264_v40 = vsub.f32 %v4193_v32, %v1262_v37 }
 0xee1   :  { %v1263_v24 = vsub.f32 %v4196_v33, %v1261_v39 }
 0xee2   :  { %v1266_v42 = vmul.f32 %v1264_v40, %v1264_v40 }
 0xee3   :  { %v1265_v41 = vmul.f32 %v1263_v24, %v1263_v24 }
 0xee4   :  { %v1270_v43 = vsel %vm200_vm6, %v1266_v42, 0.0 }
 0xee5   :  { %v1267_v27 = vsel %vm196_vm5, %v1265_v41, 0.0 }
 0xee6   :  { %1268 = vadd.xlane.f32.xlu0 %v1267_v27 }
 0xeea   :  { %1271 = vadd.xlane.f32.xlu0 %v1270_v43 }
 0xf73   :  { %v1269_v50 = vpop.xlane.xlu0 %1268 }
 0xf74   :  { %v1273_v53 = vmul.f32 0.03125, %v1269_v50 }
 0xf76   :  { %v1275_v56 = vadd.f32 1e-05, %v1273_v53 }
 0xf77   :  { %v1272_v57 = vpop.xlane.xlu0 %1271 }
 0xf78   :  { %3751 = vrsqrt.f32 %v1275_v56  ;;  %v1274_v58 = vmul.f32 0.03125, %v1272_v57 }
 0xf7a   :  { %v1276_v59 = vadd.f32 1e-05, %v1274_v58 }
 0xf7c   :  { %3753 = vrsqrt.f32 %v1276_v59 }
 0xf82   :  { %v3752_v3 = vpop.eup %3751 }
 0xf83   :  { %v1279_v5 = vmul.f32 %v3752_v3, %v1263_v24 }
 0xf85   :  { %v1285_v11 = vmul.f32 %v1284_v62, %v1279_v5 }
 0xf86   :  { %v3754_v45 = vpop.eup %3753 }
 0xf87   :  { %v1280_v12 = vmul.f32 %v3754_v45, %v1264_v40  ;;  %v1291_v7 = vadd.f32 %v1290_v6, %v1285_v11 }
 0xf89   :  { %v1286_v8 = vmul.f32 %v1284_v62, %v1280_v12  ;;  %3274 = vmatprep.mubr.msk.f32.mxu1 %vm196_vm5, %v1291_v7 }
 0xf8b   :  { %v1292_v9 = vadd.f32 %v1290_v6, %v1286_v8 }
 0xf8d   :  { %3275 = vmatmul.mubr.msk.f32.vlgmr.msra.gmra.mrb[12].mxu1 %vm196_vm5, %v1292_v9 }
0x1060   :  { %v3276_v34 = vpop.f32.mrb[12].mxu1 }
0x1061   :  { %v1379_v35 = vadd.f32 %v3276_v34, %v1377_v31  ;;  %v1365_v36 = vpop.f32.mrb[13].mxu1 }
0x1062   :  { %v1378_v37 = vadd.f32 %v1377_v31, %v1365_v36 }
0x1063   :  { %v1383_v38 = vmul.f32 0.70710677, %v1379_v35 }
0x1064   :  { %v1382_v39 = vmul.f32 0.70710677, %v1378_v37 }
0x1065   :  { %v1389_v40 = vand.u32 2147483647, %v1383_v38  ;;  %vm1385_vm10 = vcmp.ge.f32.partialorder %v1383_v38, 0.0  ;;  %v1519_v38 = vsub.s32 4, %v4020_v52 }
0x1066   :  { %v1388_v24 = vand.u32 2147483647, %v1382_v39  ;;  %vm1384_vm11 = vcmp.ge.f32.partialorder %v1382_v39, 0.0  ;;  %v1387_v28 = vsel %vm1385_vm10, 1.0, %v3929_v63 }
0x1067   :  { %v1391_v41 = vmul.f32 0.3275911, %v1389_v40  ;;  %v1417_v46 = vsub.f32 0.0, %v1389_v40  ;;  %v1386_v34 = vsel %vm1384_vm11, 1.0, %v3929_v63  ;;  %v1520_v39 = vrot.slane %v4187_v25, %v1519_v38 }
0x1068   :  { %v1390_v27 = vmul.f32 0.3275911, %v1388_v24  ;;  %v1416_v47 = vsub.f32 0.0, %v1388_v24 }
0x1069   :  { %v1393_v42 = vadd.f32 1.0, %v1391_v41  ;;  %v1419_v44 = vmul.f32 %v1417_v46, %v1389_v40 }
0x106a   :  { %v1392_v43 = vadd.f32 1.0, %v1390_v27  ;;  %v1418_v50 = vmul.f32 %v1416_v47, %v1388_v24  ;;  %v1380_v24 = vmul.f32 0.5, %v1378_v37  ;;  %v1381_v27 = vmul.f32 0.5, %v1379_v35 }
0x106b   :  { %3755 = vrcp.f32 %v1393_v42  ;;  %v1422_v57 = vmul.f32 1.442695, %v1419_v44 }
0x106c   :  { %3757 = vrcp.f32 %v1392_v43  ;;  %v1420_v62 = vmul.f32 1.442695, %v1418_v50 }
0x106d   :  { %3759 = vpow2.f32 %v1422_v57 }
0x106e   :  { %3761 = vpow2.f32 %v1420_v62 }
0x1075   :  { %v3756_v10 = vpop.eup %3755 }
0x1076   :  { %v3758_v48 = vpop.eup %3757  ;;  %v1399_v49 = vmul.f32 1.0614054, %v3756_v10 }
0x1077   :  { %v1398_v53 = vmul.f32 1.0614054, %v3758_v48  ;;  %v3760_v17 = vpop.eup %3759 }
0x1078   :  { %v1401_v56 = vadd.f32 -1.4531521, %v1399_v49  ;;  %v3762_v19 = vpop.eup %3761 }
0x1079   :  { %v1400_v58 = vadd.f32 -1.4531521, %v1398_v53 }
0x107a   :  { %v1403_v59 = vmul.f32 %v3756_v10, %v1401_v56 }
0x107b   :  { %v1402_v3 = vmul.f32 %v3758_v48, %v1400_v58 }
0x107c   :  { %v1405_v5 = vadd.f32 1.4214138, %v1403_v59 }
0x107d   :  { %v1404_v6 = vadd.f32 1.4214138, %v1402_v3 }
0x107e   :  { %v1407_v11 = vmul.f32 %v3756_v10, %v1405_v5  ;;  %v1523_v5 = vld [vmem:[#allocation5 + $0xe0] sm:$0xff] }
0x107f   :  { %v1406_v45 = vmul.f32 %v3758_v48, %v1404_v6  ;;  %v1524_v6 = vld [vmem:[#allocation5 + $0xe8] sm:$0xff] }
0x1080   :  { %v1409_v12 = vadd.f32 -0.28449672, %v1407_v11  ;;  %v3515_v11 = vpack.c.bf16 %v1524_v6, %v1523_v5 }
0x1081   :  { %v1408_v7 = vadd.f32 -0.28449672, %v1406_v45  ;;  %v1525_v45 = vld [vmem:[#allocation5 + $0xf0] sm:$0xff] }
0x1082   :  { %v1411_v8 = vmul.f32 %v3756_v10, %v1409_v12  ;;  %3516 = vmatprep.subr.bf16.mxu1 %v3515_v11  ;;  %v1526_v12 = vld [vmem:[#allocation5 + $0xf8] sm:$0xff] }
0x1083   :  { %v1410_v9 = vmul.f32 %v3758_v48, %v1408_v7  ;;  %3518 = vmatpush3.bf16.msra.mxu1 %v3515_v11  ;;  %v3519_v7 = vpack.c.bf16 %v1526_v12, %v1525_v45 }
0x1084   :  { %v1413_v13 = vadd.f32 0.2548296, %v1411_v8 }
0x1085   :  { %v1412_v14 = vadd.f32 0.2548296, %v1410_v9  ;;  %3520 = vmatprep.subr.bf16.mxu1 %v3519_v7 }
0x1086   :  { %v1415_v15 = vmul.f32 %v3756_v10, %v1413_v13 }
0x1087   :  { %v1414_v18 = vmul.f32 %v3758_v48, %v1412_v14  ;;  %3522 = vmatpush3.bf16.msra.mxu1 %v3519_v7 }
0x1088   :  { %v1425_v20 = vmul.f32 %v3760_v17, %v1415_v15 }
0x1089   :  { %v1424_v21 = vmul.f32 %v3762_v19, %v1414_v18  ;;  %v1572_v18 = vrot.slane %v4187_v25, %v4023_v54 }
0x108a   :  { %v1427_v22 = vsub.f32 1.0, %v1425_v20 }
0x108b   :  { %v1426_v29 = vsub.f32 1.0, %v1424_v21 }
0x108c   :  { %v1429_v31 = vmul.f32 %v1427_v22, %v1387_v28  ;;  %v1578_v22 = vrot.slane %v4187_v25, %v233_v55 }
0x108d   :  { %v1428_v36 = vmul.f32 %v1426_v29, %v1386_v34 }
0x108e   :  { %v1431_v40 = vadd.f32 1.0, %v1429_v31 }
0x108f   :  { %v1430_v41 = vadd.f32 1.0, %v1428_v36 }
0x1090   :  { %v1433_v43 = vmul.f32 %v1431_v40, %v1381_v27  ;;  %v1665_v40 = vrot.slane %v4187_v25, %v320_v4 }
0x1091   :  { %v1432_v42 = vmul.f32 %v1430_v41, %v1380_v24 }
0x1093   :  { %3293 = vmatprep.mubr.msk.f32.mxu0 %vm66_vm1, %v1432_v42 }
0x1094   :  { %3294 = vmatmul.mubr.msk.f32.vlgmr.msra.gmra.mrb[10].mxu0 %vm66_vm1, %v1433_v43 }
0x1167   :  { %v3295_v46 = vpop.f32.mrb[10].mxu0 }
0x1168   :  { %v1516_v47 = vadd.f32 %v3295_v46, %v4193_v32  ;;  %v1506_v10 = vpop.f32.mrb[11].mxu0 }
0x1169   :  { %v1515_v37 = vadd.f32 %v1506_v10, %v4196_v33 }
0x116a   :  { %v4230_v44 = vadd.f32 %v1520_v39, %v1516_v47 }
0x116b   :  { %v4232_v35 = vadd.f32 %v1520_v39, %v1515_v37 }
0x116c   :  { %v1546_v48 = vsel %vm200_vm6, %v4230_v44, 0.0 }
0x116d   :  { %1547 = vadd.xlane.f32.xlu1 %v1546_v48  ;;  %v1543_v49 = vsel %vm196_vm5, %v4232_v35, 0.0 }
0x116e   :  { %1544 = vadd.xlane.f32.xlu0 %v1543_v49 }
0x11fa   :  { %v1548_v50 = vpop.xlane.xlu1 %1547 }
0x11fb   :  { %v1550_v53 = vmul.f32 0.03125, %v1548_v50  ;;  %v1545_v56 = vpop.xlane.xlu0 %1544 }
0x11fc   :  { %v1549_v57 = vmul.f32 0.03125, %v1545_v56 }
0x11fd   :  { %v1552_v32 = vsub.f32 %v4230_v44, %v1550_v53 }
0x11fe   :  { %v1551_v33 = vsub.f32 %v4232_v35, %v1549_v57 }
0x11ff   :  { %v1554_v58 = vmul.f32 %v1552_v32, %v1552_v32 }
0x1200   :  { %v1553_v59 = vmul.f32 %v1551_v33, %v1551_v33 }
0x1201   :  { %v1558_v62 = vsel %vm200_vm6, %v1554_v58, 0.0 }
0x1202   :  { %1559 = vadd.xlane.f32.xlu1 %v1558_v62  ;;  %v1555_v3 = vsel %vm196_vm5, %v1553_v59, 0.0 }
0x1203   :  { %1556 = vadd.xlane.f32.xlu0 %v1555_v3 }
0x128f   :  { %v1560_v8 = vpop.xlane.xlu1 %1559 }
0x1290   :  { %v1562_v9 = vmul.f32 0.03125, %v1560_v8  ;;  %v1557_v13 = vpop.xlane.xlu0 %1556 }
0x1291   :  { %v1561_v14 = vmul.f32 0.03125, %v1557_v13 }
0x1292   :  { %v1564_v15 = vadd.f32 1e-05, %v1562_v9 }
0x1293   :  { %v1563_v17 = vadd.f32 1e-05, %v1561_v14 }
0x1294   :  { %3763 = vrsqrt.f32 %v1564_v15 }
0x1295   :  { %3765 = vrsqrt.f32 %v1563_v17 }
0x129e   :  { %v3764_v19 = vpop.eup %3763 }
0x129f   :  { %v3766_v20 = vpop.eup %3765  ;;  %v1568_v21 = vmul.f32 %v3764_v19, %v1552_v32 }
0x12a0   :  { %v1567_v28 = vmul.f32 %v3766_v20, %v1551_v33 }
0x12a1   :  { %v1574_v29 = vmul.f32 %v1572_v18, %v1568_v21 }
0x12a2   :  { %v1573_v31 = vmul.f32 %v1572_v18, %v1567_v28 }
0x12a3   :  { %v1580_v36 = vadd.f32 %v1578_v22, %v1574_v29 }
0x12a4   :  { %v1579_v34 = vadd.f32 %v1578_v22, %v1573_v31 }
0x12a6   :  { %3304 = vmatprep.mubr.msk.f32.mxu1 %vm196_vm5, %v1579_v34 }
0x12a7   :  { %3305 = vmatmul.mubr.msk.f32.vlgmr.msra.gmra.mrb[14].mxu1 %vm196_vm5, %v1580_v36 }
0x137a   :  { %v3306_v24 = vpop.f32.mrb[14].mxu1 }
0x137b   :  { %v1667_v41 = vadd.f32 %v3306_v24, %v1665_v40  ;;  %v1653_v27 = vpop.f32.mrb[15].mxu1 }
0x137c   :  { %v1666_v42 = vadd.f32 %v1665_v40, %v1653_v27 }
0x137d   :  { %v4264_v4 = vmul.f32 0.35355338, %v1667_v41 }
0x137e   :  { %v4252_v43 = vpack.i.bf16 %v1667_v41, %v1666_v42  ;;  %v4254_v55 = vmul.f32 0.35355338, %v1666_v42 }
0x1380   :  { %3681 = vrot.lane.b32.xlu1 %v4252_v43, %s3914_s21  ;;  %3676 = vrot.lane.b32.xlu0 %v4252_v43, %s3913_s2 }
0x1381   :  { %3311 = vmatprep.mubr.msk.f32.mxu1 %vm332_vm7, %v4254_v55 }
0x1384   :  { %1871 = vrot.lane.b32.xlu1 %v4254_v55, %s3915_s22 }
0x1388   :  { %1873 = vrot.lane.b32.xlu1 %v4264_v4, %s3915_s22 }
0x13f2   :  { %v3682_v25 = vpop.permute.xlu1 %3681  ;;  %v3677_v39 = vpop.permute.xlu0 %3676 }
0x13f3   :  { %v3684_v46 = vunpack.i.h.bf16 %v3682_v25  ;;  %v3683_v47 = vunpack.i.l.bf16 %v3682_v25  ;;  %v3679_v10 = vunpack.i.h.bf16 %v3677_v39  ;;  %v3678_v37 = vunpack.i.l.bf16 %v3677_v39 }
0x13f5   :  { %v3523_v48 = vpack.c.bf16 %v3679_v10, %v3678_v37  ;;  %v3535_v49 = vpack.c.bf16 %v3684_v46, %v3683_v47 }
0x13f6   :  { %v1872_v50 = vpop.permute.xlu1 %1871 }
0x13f7   :  { %3525 = vmatprep.subr.msk.bf16.mxu1 %vm4055_vm8, %v3523_v48 }
0x13f8   :  { %3528 = vmatpush3.bf16.xpose.msk.msra.mxu1 %vm4055_vm8, %v3523_v48 }
0x13f9   :  { %3537 = vmatprep.subr.msk.bf16.mxu1 %vm4055_vm8, %v3535_v49 }
0x13fa   :  { %v1874_v53 = vpop.permute.xlu1 %1873 }
0x13ff   :  { %3312 = vmatmul.mubr.msk.f32.vlgmr.msra.gmra.mrb[16].mxu1 %vm332_vm7, %v4264_v4 }
0x1400   :  { %3540 = vmatpush3.bf16.xpose.msk.msra.mxu1 %vm4055_vm8, %v3535_v49  ;;  %3325 = vmatprep.mubr.msk.f32.mxu1 %vm332_vm7, %v1872_v50 }
0x1407   :  { %3326 = vmatmul.mubr.msk.f32.vlgmr.msra.gmra.mrb[18].mxu1 %vm332_vm7, %v1874_v53 }
0x14d2   :  { %v3313_v56 = vpop.f32.mrb[16].mxu1 }
0x14d3   :  { %v1758_v57 = vadd.f32 %v3313_v56, %v4068_v26  ;;  %v1752_v32 = vpop.f32.mrb[17].mxu1 }
0x14d4   :  { %v1753_v33 = vadd.f32 %v1752_v32, %v4066_v23 }
0x14d5   :  { %v1764_v58 = vsel %vm422_vm13, %v1758_v57, -inf }
0x14d6   :  { %1765 = vmax.xlane.f32.xlu1 %v1764_v58  ;;  %v1761_v59 = vsel %vm418_vm12, %v1753_v33, -inf }
0x14d7   :  { %1762 = vmax.xlane.f32.xlu0 %v1761_v59 }
0x14da   :  { %v3327_v62 = vpop.f32.mrb[18].mxu1 }
0x14db   :  { %v1953_v3 = vpop.f32.mrb[19].mxu1  ;;  %v1959_v6 = vadd.f32 %v3327_v62, %v4068_v26 }
0x14dc   :  { %v1954_v5 = vadd.f32 %v1953_v3, %v4066_v23 }
0x14dd   :  { %v1965_v45 = vsel %vm422_vm13, %v1959_v6, -inf }
0x14de   :  { %v1962_v11 = vsel %vm418_vm12, %v1954_v5, -inf }
0x14df   :  { %1963 = vmax.xlane.f32.xlu0 %v1962_v11 }
0x14e3   :  { %1966 = vmax.xlane.f32.xlu0 %v1965_v45 }
0x1563   :  { %v1766_v12 = vpop.xlane.xlu1 %1765 }
0x1564   :  { %v1768_v7 = vsub.f32 %v1758_v57, %v1766_v12  ;;  %v1763_v8 = vpop.xlane.xlu0 %1762 }
0x1565   :  { %v1767_v9 = vsub.f32 %v1753_v33, %v1763_v8 }
0x1566   :  { %v1771_v13 = vmul.f32 1.442695, %v1768_v7 }
0x1567   :  { %v1769_v14 = vmul.f32 1.442695, %v1767_v9 }
0x1568   :  { %3767 = vpow2.f32 %v1771_v13 }
0x1569   :  { %3769 = vpow2.f32 %v1769_v14 }
0x156c   :  { %v1964_v15 = vpop.xlane.xlu0 %1963 }
0x156d   :  { %v1968_v17 = vsub.f32 %v1954_v5, %v1964_v15 }
0x156f   :  { %v1970_v18 = vmul.f32 1.442695, %v1968_v17 }
0x1570   :  { %v1967_v19 = vpop.xlane.xlu0 %1966 }
0x1571   :  { %3771 = vpow2.f32 %v1970_v18  ;;  %v1969_v20 = vsub.f32 %v1959_v6, %v1967_v19 }
0x1572   :  { %v3768_v21 = vpop.eup %3767 }
0x1573   :  { %v3770_v22 = vpop.eup %3769  ;;  %v1972_v28 = vmul.f32 1.442695, %v1969_v20  ;;  %v1776_v29 = vsel %vm422_vm13, %v3768_v21, 0.0 }
0x1574   :  { %1777 = vadd.xlane.f32.xlu1 %v1776_v29  ;;  %v1773_v31 = vsel %vm418_vm12, %v3770_v22, 0.0 }
0x1575   :  { %3773 = vpow2.f32 %v1972_v28  ;;  %1774 = vadd.xlane.f32.xlu0 %v1773_v31 }
0x157b   :  { %v3772_v34 = vpop.eup %3771 }
0x157c   :  { %v1974_v36 = vsel %vm418_vm12, %v3772_v34, 0.0 }
0x157d   :  { %1975 = vadd.xlane.f32.xlu0 %v1974_v36 }
0x157f   :  { %v3774_v40 = vpop.eup %3773 }
0x1580   :  { %v1977_v24 = vsel %vm422_vm13, %v3774_v40, 0.0 }
0x1581   :  { %1978 = vadd.xlane.f32.xlu1 %v1977_v24 }
0x1592   :  { %3691 = vrot.lane.b32.xlu1 %v4252_v43, %s3920_s25 }
0x1593   :  { %3686 = vrot.lane.b32.xlu0 %v4252_v43, %s3918_s24 }
0x1596   :  { %3696 = vrot.lane.b32.xlu1 %v4252_v43, %s3922_s27 }
0x1597   :  { %2074 = vrot.lane.b32.xlu0 %v4264_v4, %s3921_s26 }
0x159a   :  { %2072 = vrot.lane.b32.xlu1 %v4254_v55, %s3921_s26 }
0x1601   :  { %v1778_v27 = vpop.xlane.xlu1 %1777 }
0x1602   :  { %v1775_v41 = vpop.xlane.xlu0 %1774 }
0x1603   :  { %3775 = vrcp.f32 %v1775_v41 }
0x1604   :  { %3777 = vrcp.f32 %v1778_v27 }
0x160a   :  { %v1976_v42 = vpop.xlane.xlu0 %1975 }
0x160b   :  { %3779 = vrcp.f32 %v1976_v42 }
0x160d   :  { %v3776_v25 = vpop.eup %3775 }
0x160e   :  { %v1979_v39 = vpop.xlane.xlu1 %1978  ;;  %v3687_v46 = vpop.permute.xlu0 %3686  ;;  %v1781_v47 = vmul.f32 %v3776_v25, %v3770_v22 }
0x160f   :  { %3781 = vrcp.f32 %v1979_v39  ;;  %v3689_v10 = vunpack.i.h.bf16 %v3687_v46  ;;  %v3688_v37 = vunpack.i.l.bf16 %v3687_v46  ;;  %v3778_v49 = vpop.eup %3777 }
0x1610   :  { %3318 = vmatprep.mubr.msk.f32.mxu0 %vm418_vm12, %v1781_v47  ;;  %v1782_v32 = vmul.f32 %v3778_v49, %v3768_v21 }
0x1611   :  { %v3529_v48 = vpack.c.bf16 %v3689_v10, %v3688_v37 }
0x1612   :  { %v3692_v50 = vpop.permute.xlu1 %3691  ;;  %v2075_v12 = vpop.permute.xlu0 %2074 }
0x1613   :  { %v3694_v53 = vunpack.i.h.bf16 %v3692_v50  ;;  %v3693_v56 = vunpack.i.l.bf16 %v3692_v50  ;;  %3531 = vmatprep.subr.msk.bf16.mxu0 %vm4078_vm3, %v3529_v48 }
0x1614   :  { %3534 = vmatpush3.bf16.msk.msra.mxu0 %vm4078_vm3, %v3529_v48 }
0x1615   :  { %v3780_v57 = vpop.eup %3779  ;;  %v3541_v33 = vpack.c.bf16 %v3694_v53, %v3693_v56 }
0x1616   :  { %v3697_v58 = vpop.permute.xlu1 %3696  ;;  %v1982_v59 = vmul.f32 %v3780_v57, %v3772_v34 }
0x1617   :  { %v3699_v62 = vunpack.i.h.bf16 %v3697_v58  ;;  %v3698_v3 = vunpack.i.l.bf16 %v3697_v58  ;;  %3319 = vmatmul.mubr.msk.f32.vlgmr.msra.gmra.mrb[12].mxu0 %vm418_vm12, %v1782_v32  ;;  %3543 = vmatprep.subr.msk.bf16.mxu0 %vm4078_vm3, %v3541_v33 }
0x1618   :  { %3546 = vmatpush3.bf16.msk.msra.mxu0 %vm4078_vm3, %v3541_v33  ;;  %3332 = vmatprep.mubr.msk.f32.mxu0 %vm418_vm12, %v1982_v59 }
0x1619   :  { %v3782_v5 = vpop.eup %3781  ;;  %v3547_v6 = vpack.c.bf16 %v3699_v62, %v3698_v3 }
0x161a   :  { %v1983_v11 = vmul.f32 %v3782_v5, %v3774_v40  ;;  %v2073_v45 = vpop.permute.xlu1 %2072 }
0x161b   :  { %3549 = vmatprep.subr.msk.bf16.mxu0 %vm4055_vm8, %v3547_v6 }
0x161c   :  { %3333 = vmatmul.mubr.msk.f32.vlgmr.msra.gmra.mrb[14].mxu0 %vm418_vm12, %v1983_v11 }
0x161d   :  { %3339 = vmatprep.mubr.msk.f32.mxu0 %vm332_vm7, %v2073_v45 }
0x1621   :  { %3552 = vmatpush3.bf16.xpose.msk.msra.mxu0 %vm4055_vm8, %v3547_v6 }
0x1628   :  { %3340 = vmatmul.mubr.msk.f32.vlgmr.msra.gmra.mrb[16].mxu0 %vm332_vm7, %v2075_v12 }
0x16ea   :  { %v4320_v7 = vpop.f32.mrb[12].mxu0 }
0x16eb   :  { %v4322_v8 = vpop.f32.mrb[13].mxu0 }
0x16ef   :  { %v4324_v9 = vpop.f32.mrb[14].mxu0 }
0x16f0   :  { %v4326_v13 = vpop.f32.mrb[15].mxu0 }
0x16fb   :  { %v3341_v14 = vpop.f32.mrb[16].mxu0 }
0x16fc   :  { %v2160_v15 = vadd.f32 %v3341_v14, %v4068_v26  ;;  %v2154_v17 = vpop.f32.mrb[17].mxu0 }
0x16fd   :  { %v2155_v18 = vadd.f32 %v2154_v17, %v4066_v23 }
0x16fe   :  { %v2166_v19 = vsel %vm422_vm13, %v2160_v15, -inf }
0x16ff   :  { %2167 = vmax.xlane.f32.xlu0 %v2166_v19  ;;  %v2163_v20 = vsel %vm418_vm12, %v2155_v18, -inf }
0x1700   :  { %2164 = vmax.xlane.f32.xlu1 %v2163_v20 }
0x1711   :  { %3701 = vrot.lane.b32.xlu1 %v4252_v43, %s3923_s28 }
0x1715   :  { %2273 = vrot.lane.b32.xlu1 %v4254_v55, %s3924_s29 }
0x1719   :  { %2275 = vrot.lane.b32.xlu1 %v4264_v4, %s3924_s29 }
0x178c   :  { %v2168_v21 = vpop.xlane.xlu0 %2167 }
0x178d   :  { %v2170_v22 = vsub.f32 %v2160_v15, %v2168_v21  ;;  %v2165_v28 = vpop.xlane.xlu1 %2164 }
0x178e   :  { %v2169_v29 = vsub.f32 %v2155_v18, %v2165_v28 }
0x178f   :  { %v2173_v31 = vmul.f32 1.442695, %v2170_v22 }
0x1790   :  { %v2171_v34 = vmul.f32 1.442695, %v2169_v29 }
0x1791   :  { %3783 = vpow2.f32 %v2173_v31  ;;  %v3702_v36 = vpop.permute.xlu1 %3701 }
0x1792   :  { %v3704_v40 = vunpack.i.h.bf16 %v3702_v36  ;;  %v3703_v24 = vunpack.i.l.bf16 %v3702_v36  ;;  %3785 = vpow2.f32 %v2171_v34  ;;  %v1527_v34 = vld [vmem:[#allocation5 + $0x100] sm:$0xff]  ;;  %v1528_v36 = vld [vmem:[#allocation5 + $0x108] sm:$0xff] }
0x1794   :  { %v3553_v41 = vpack.c.bf16 %v3704_v40, %v3703_v24  ;;  %v1529_v40 = vld [vmem:[#allocation5 + $0x110] sm:$0xff]  ;;  %v3571_v24 = vpack.c.bf16 %v1528_v36, %v1527_v34 }
0x1795   :  { %v2274_v56 = vpop.permute.xlu1 %2273 }
0x1796   :  { %3555 = vmatprep.subr.msk.bf16.mxu1 %vm4078_vm3, %v3553_v41 }
0x1797   :  { %3558 = vmatpush3.bf16.msk.msra.mxu1 %vm4078_vm3, %v3553_v41  ;;  %v1530_v41 = vld [vmem:[#allocation5 + $0x118] sm:$0xff] }
0x1799   :  { %v2276_v57 = vpop.permute.xlu1 %2275 }
0x179b   :  { %v3784_v55 = vpop.eup %3783 }
0x179c   :  { %v2178_v4 = vsel %vm422_vm13, %v3784_v55, 0.0  ;;  %v3786_v27 = vpop.eup %3785 }
0x179d   :  { %2179 = vadd.xlane.f32.xlu0 %v2178_v4  ;;  %v2175_v42 = vsel %vm418_vm12, %v3786_v27, 0.0 }
0x17a1   :  { %2176 = vadd.xlane.f32.xlu0 %v2175_v42 }
0x17b7   :  { %3706 = vrot.lane.b32.xlu0 %v4252_v43, %s3925_s30 }
0x182a   :  { %v2180_v25 = vpop.xlane.xlu0 %2179 }
0x182b   :  { %3787 = vrcp.f32 %v2180_v25 }
0x182e   :  { %v2177_v39 = vpop.xlane.xlu0 %2176 }
0x182f   :  { %3789 = vrcp.f32 %v2177_v39 }
0x1832   :  { %v3707_v46 = vpop.permute.xlu0 %3706 }
0x1833   :  { %v3709_v47 = vunpack.i.h.bf16 %v3707_v46  ;;  %v3708_v10 = vunpack.i.l.bf16 %v3707_v46 }
0x1835   :  { %v3559_v37 = vpack.c.bf16 %v3709_v47, %v3708_v10  ;;  %v3788_v48 = vpop.eup %3787 }
0x1836   :  { %v2184_v53 = vmul.f32 %v3788_v48, %v3784_v55  ;;  %v3575_v55 = vpack.c.bf16 %v1530_v41, %v1529_v40 }
0x1837   :  { %3561 = vmatprep.subr.msk.bf16.mxu1 %vm4055_vm8, %v3559_v37 }
0x1839   :  { %v3790_v49 = vpop.eup %3789 }
0x183a   :  { %v2183_v50 = vmul.f32 %v3790_v49, %v3786_v27 }
0x183c   :  { %3346 = vmatprep.mubr.msk.f32.mxu1 %vm418_vm12, %v2183_v50 }
0x183d   :  { %3347 = vmatmul.mubr.msk.f32.vlgmr.msra.gmra.mrb[20].mxu1 %vm418_vm12, %v2184_v53 }
0x183e   :  { %3564 = vmatpush3.bf16.xpose.msk.msra.mxu1 %vm4055_vm8, %v3559_v37  ;;  %3353 = vmatprep.mubr.msk.f32.mxu1 %vm332_vm7, %v2274_v56  ;;  %v4386_v56 = vld [vmem:[#allocation7 + $0x10] sm:$0x3f] }
0x183f   :  { %v2628_v34 = vrot.slane %v4386_v56, %v1289_v61  ;;  %v1538_v61 = vld [vmem:[#allocation5 + $0x158] sm:$0xff] }
0x1845   :  { %3354 = vmatmul.mubr.msk.f32.vlgmr.msra.gmra.mrb[22].mxu1 %vm332_vm7, %v2276_v57 }
0x1910   :  { %v3348_v32 = vpop.f32.mrb[20].mxu1 }
0x1911   :  { %v2264_v33 = vpop.f32.mrb[21].mxu1 }
0x1918   :  { %v3355_v58 = vpop.f32.mrb[22].mxu1 }
0x1919   :  { %v2361_v59 = vadd.f32 %v3355_v58, %v4068_v26  ;;  %v2355_v62 = vpop.f32.mrb[23].mxu1 }
0x191a   :  { %v2356_v3 = vadd.f32 %v2355_v62, %v4066_v23 }
0x191b   :  { %v2367_v5 = vsel %vm422_vm13, %v2361_v59, -inf }
0x191c   :  { %2368 = vmax.xlane.f32.xlu0 %v2367_v5  ;;  %v2364_v6 = vsel %vm418_vm12, %v2356_v3, -inf }
0x191d   :  { %2365 = vmax.xlane.f32.xlu1 %v2364_v6 }
0x192e   :  { %3711 = vrot.lane.b32.xlu1 %v4252_v43, %s3926_s4 }
0x1932   :  { %2478 = vrot.lane.b32.xlu1 %v4324_v9, %s3907_s23 }
0x1936   :  { %2484 = vrot.lane.b32.xlu1 %v2264_v33, %s3927_s5 }
0x193a   :  { %2486 = vrot.lane.b32.xlu1 %v3348_v32, %s3927_s5 }
0x19a9   :  { %v2369_v16 = vpop.xlane.xlu0 %2368 }
0x19aa   :  { %v2371_v26 = vsub.f32 %v2361_v59, %v2369_v16  ;;  %v2366_v11 = vpop.xlane.xlu1 %2365 }
0x19ab   :  { %v2370_v23 = vsub.f32 %v2356_v3, %v2366_v11 }
0x19ac   :  { %v2374_v45 = vmul.f32 1.442695, %v2371_v26 }
0x19ad   :  { %v2372_v12 = vmul.f32 1.442695, %v2370_v23 }
0x19ae   :  { %v3712_v14 = vpop.permute.xlu1 %3711 }
0x19af   :  { %3791 = vpow2.f32 %v2372_v12  ;;  %v3714_v15 = vunpack.i.h.bf16 %v3712_v14  ;;  %v3713_v17 = vunpack.i.l.bf16 %v3712_v14  ;;  %v1531_v12 = vld [vmem:[#allocation5 + $0x120] sm:$0xff]  ;;  %v1532_v14 = vld [vmem:[#allocation5 + $0x128] sm:$0xff] }
0x19b0   :  { %3793 = vpow2.f32 %v2374_v45 }
0x19b1   :  { %v3565_v18 = vpack.c.bf16 %v3714_v15, %v3713_v17  ;;  %v3579_v15 = vpack.c.bf16 %v1532_v14, %v1531_v12  ;;  %v1533_v17 = vld [vmem:[#allocation5 + $0x130] sm:$0xff] }
0x19b2   :  { %v2479_v27 = vpop.permute.xlu1 %2478 }
0x19b3   :  { %3567 = vmatprep.subr.msk.bf16.mxu0 %vm4078_vm3, %v3565_v18  ;;  %v2499_v10 = vsel %vm332_vm7, %v4320_v7, %v2479_v27  ;;  %3580 = vmatprep.subr.bf16.mxu1 %v3579_v15 }
0x19b4   :  { %3570 = vmatpush3.bf16.msk.msra.mxu0 %vm4078_vm3, %v3565_v18  ;;  %3582 = vmatpush3.bf16.msra.mxu1 %v3579_v15  ;;  %v1534_v18 = vld [vmem:[#allocation5 + $0x138] sm:$0xff] }
0x19b5   :  { %3572 = vmatprep.subr.bf16.mxu0 %v3571_v24 }
0x19b6   :  { %v2485_v42 = vpop.permute.xlu1 %2484 }
0x19b9   :  { %v3792_v43 = vpop.eup %3791 }
0x19ba   :  { %v2376_v9 = vsel %vm418_vm12, %v3792_v43, 0.0  ;;  %v3794_v19 = vpop.eup %3793  ;;  %v2487_v39 = vpop.permute.xlu1 %2486 }
0x19bb   :  { %2377 = vadd.xlane.f32.xlu0 %v2376_v9  ;;  %v2379_v20 = vsel %vm422_vm13, %v3794_v19, 0.0  ;;  %v2501_v49 = vsel %vm1160_vm4, %v2499_v10, %v2487_v39  ;;  %v1539_v39 = vld [vmem:[#allocation5 + $0x160] sm:$0xff]  ;;  %v1541_v10 = vld [vmem:[#allocation5 + $0x170] sm:$0xff] }
0x19bf   :  { %2380 = vadd.xlane.f32.xlu0 %v2379_v20 }
0x19d5   :  { %2476 = vrot.lane.b32.xlu0 %v4326_v13, %s3907_s23  ;;  %s3930_s23 = smov [#allocation8]  }
0x19d6   :  { %s2950_s7 = sshll.u32 %s3930_s23, 4  ;;  %s2951_s7 = int_to_ptr.vmem [resolvable:$true] %s2950_s7 }
0x19d7   :  { %s3877_s8 = scalar_lea.vmem %s2951_s7, 32  ;;  %p3882_p11 = scmp.lt.s32.totalorder %s2951_s7, %s2951_s7 }
0x19d8   :  { %p3878_p10 = scmp.ne.s32.totalorder %s2951_s7, %s3877_s8  ;;  %p3883_p12 = scmp.lt.s32.totalorder %s3877_s8, %s3877_s8 }
0x19da   :  { %p3884_p13 = por %p3883_p12, %p3882_p11 }
0x19dc   :  { %p3885_p0 = pnand %p3884_p13, %p3878_p10 }
0x1a48   :  { %v2378_v21 = vpop.xlane.xlu0 %2377 }
0x1a49   :  { %3795 = vrcp.f32 %v2378_v21 }
0x1a4c   :  { %v2381_v22 = vpop.xlane.xlu0 %2380 }
0x1a4d   :  { %3797 = vrcp.f32 %v2381_v22 }
0x1a50   :  { %v2477_v25 = vpop.permute.xlu0 %2476 }
0x1a51   :  { %v2498_v46 = vsel %vm332_vm7, %v4322_v8, %v2477_v25  ;;  %v2588_v8 = vrot.slane %v4386_v56, %v1249_v2 }
0x1a52   :  { %v2500_v37 = vsel %vm1160_vm4, %v2498_v46, %v2485_v42  ;;  %v1537_v42 = vld [vmem:[#allocation5 + $0x150] sm:$0xff]  ;;  %v1540_v46 = vld [vmem:[#allocation5 + $0x168] sm:$0xff] }
0x1a53   :  { %v3796_v28 = vpop.eup %3795  ;;  %v3591_v25 = vpack.c.bf16 %v1538_v61, %v1537_v42 }
0x1a54   :  { %v2384_v29 = vmul.f32 %v3796_v28, %v3792_v43  ;;  %v3583_v43 = vpack.c.bf16 %v1534_v18, %v1533_v17 }
0x1a56   :  { %3360 = vmatprep.mubr.msk.f32.mxu0 %vm418_vm12, %v2384_v29  ;;  %3584 = vmatprep.subr.bf16.mxu1 %v3583_v43  ;;  %v2622_v29 = vrot.slane %v4386_v56, %v1283_v60  ;;  %v1535_v60 = vld [vmem:[#allocation5 + $0x140] sm:$0xff] }
0x1a57   :  { %v3798_v51 = vpop.eup %3797  ;;  %3586 = vmatpush3.bf16.msra.mxu1 %v3583_v43 }
0x1a58   :  { %v2385_v31 = vmul.f32 %v3798_v51, %v3794_v19  ;;  %3603 = vmatprep.subr.bf16.mxu1 %v3910_v0 }
0x1a5a   :  { %3361 = vmatmul.mubr.msk.f32.vlgmr.msra.gmra.mrb[18].mxu0 %vm418_vm12, %v2385_v31 }
0x1a5b   :  { %3574 = vmatpush3.bf16.msra.mxu0 %v3571_v24 }
0x1a5c   :  { %3576 = vmatprep.subr.bf16.mxu0 %v3575_v55 }
0x1a5f   :  { %3578 = vmatpush3.bf16.msra.mxu0 %v3575_v55 }
0x1b2d   :  { %v3362_v13 = vpop.f32.mrb[18].mxu0 }
0x1b2e   :  { %2494 = vrot.lane.b32.xlu1 %v3362_v13, %s3928_s6  ;;  %v2465_v4 = vpop.f32.mrb[19].mxu0 }
0x1b2f   :  { %2492 = vrot.lane.b32.xlu0 %v2465_v4, %s3928_s6  ;;  %v1536_v4 = vld [vmem:[#allocation5 + $0x148] sm:$0xff] }
0x1b30   :  { %v3587_v27 = vpack.c.bf16 %v1536_v4, %v1535_v60 }
0x1b32   :  { %3588 = vmatprep.subr.bf16.mxu0 %v3587_v27 }
0x1ba0   :  { %v2495_v47 = vpop.permute.xlu1 %2494 }
0x1ba1   :  { %v2493_v48 = vpop.permute.xlu0 %2492  ;;  %v2503_v53 = vsel %vm1163_vm9, %v2501_v49, %v2495_v47  ;;  %v3595_v47 = vpack.c.bf16 %v1540_v46, %v1539_v39 }
0x1ba2   :  { %v2502_v50 = vsel %vm1163_vm9, %v2500_v37, %v2493_v48  ;;  %v1542_v37 = vld [vmem:[#allocation5 + $0x178] sm:$0xff] }
0x1ba3   :  { %3371 = vmatprep.mubr.msk.f32.mxu0 %vm196_vm5, %v2502_v50  ;;  %v3599_v48 = vpack.c.bf16 %v1542_v37, %v1541_v10  ;;  %v2862_v37 = vld [vmem:[#allocation5 + $0x180] sm:$0xff] }
0x1ba4   :  { %3372 = vmatmul.mubr.msk.f32.vlgmr.msra.gmra.mrb[20].mxu0 %vm196_vm5, %v2503_v53 }
0x1ba5   :  { %3590 = vmatpush3.bf16.msra.mxu0 %v3587_v27 }
0x1ba6   :  { %3592 = vmatprep.subr.bf16.mxu0 %v3591_v25 }
0x1ba9   :  { %3594 = vmatpush3.bf16.msra.mxu0 %v3591_v25 }
0x1baa   :  { %3596 = vmatprep.subr.bf16.mxu0 %v3595_v47 }
0x1bad   :  { %3598 = vmatpush3.bf16.msra.mxu0 %v3595_v47 }
0x1bae   :  { %3600 = vmatprep.subr.bf16.mxu0 %v3599_v48 }
0x1bb1   :  { %3602 = vmatpush3.bf16.msra.mxu0 %v3599_v48  ;;  %v2863_v48 = vld [vmem:[#allocation5 + $0x188] sm:$0xff] }
0x1c77   :  { %v3373_v7 = vpop.f32.mrb[20].mxu0 }
0x1c78   :  { %v2590_v57 = vadd.f32 %v3373_v7, %v2588_v8  ;;  %v2576_v32 = vpop.f32.mrb[21].mxu0 }
0x1c79   :  { %v2589_v33 = vadd.f32 %v2588_v8, %v2576_v32 }
0x1c7a   :  { %v2592_v58 = vadd.f32 %v2590_v57, %v4230_v44 }
0x1c7b   :  { %v4393_v59 = vadd.f32 %v2589_v33, %v4232_v35 }
0x1c7c   :  { %v2596_v62 = vsel %vm200_vm6, %v2592_v58, 0.0 }
0x1c7d   :  { %2597 = vadd.xlane.f32.xlu1 %v2596_v62  ;;  %v2593_v3 = vsel %vm196_vm5, %v4393_v59, 0.0 }
0x1c7e   :  { %2594 = vadd.xlane.f32.xlu0 %v2593_v3 }
0x1d0a   :  { %v2598_v5 = vpop.xlane.xlu1 %2597 }
0x1d0b   :  { %v2600_v6 = vmul.f32 0.03125, %v2598_v5  ;;  %v2595_v16 = vpop.xlane.xlu0 %2594 }
0x1d0c   :  { %v2599_v2 = vmul.f32 0.03125, %v2595_v16 }
0x1d0d   :  { %v2602_v26 = vsub.f32 %v2592_v58, %v2600_v6 }
0x1d0e   :  { %v2601_v11 = vsub.f32 %v4393_v59, %v2599_v2 }
0x1d0f   :  { %v2604_v45 = vmul.f32 %v2602_v26, %v2602_v26 }
0x1d10   :  { %v2603_v23 = vmul.f32 %v2601_v11, %v2601_v11 }
0x1d11   :  { %v2608_v35 = vsel %vm200_vm6, %v2604_v45, 0.0 }
0x1d12   :  { %v2605_v44 = vsel %vm196_vm5, %v2603_v23, 0.0 }
0x1d13   :  { %2606 = vadd.xlane.f32.xlu0 %v2605_v44 }
0x1d17   :  { %2609 = vadd.xlane.f32.xlu0 %v2608_v35 }
0x1da0   :  { %v2607_v9 = vpop.xlane.xlu0 %2606 }
0x1da1   :  { %v2611_v19 = vmul.f32 0.03125, %v2607_v9 }
0x1da3   :  { %v2613_v20 = vadd.f32 1e-05, %v2611_v19 }
0x1da4   :  { %v2610_v21 = vpop.xlane.xlu0 %2609 }
0x1da5   :  { %3799 = vrsqrt.f32 %v2613_v20  ;;  %v2612_v22 = vmul.f32 0.03125, %v2610_v21 }
0x1da7   :  { %v2614_v28 = vadd.f32 1e-05, %v2612_v22 }
0x1da9   :  { %3801 = vrsqrt.f32 %v2614_v28 }
0x1daf   :  { %v3800_v51 = vpop.eup %3799 }
0x1db0   :  { %v2617_v31 = vmul.f32 %v3800_v51, %v2601_v11 }
0x1db2   :  { %v2623_v36 = vmul.f32 %v2622_v29, %v2617_v31 }
0x1db3   :  { %v3802_v40 = vpop.eup %3801 }
0x1db4   :  { %v2618_v24 = vmul.f32 %v3802_v40, %v2602_v26  ;;  %v2629_v41 = vadd.f32 %v2628_v34, %v2623_v36 }
0x1db6   :  { %v2624_v55 = vmul.f32 %v2622_v29, %v2618_v24  ;;  %3382 = vmatprep.mubr.msk.f32.mxu1 %vm196_vm5, %v2629_v41 }
0x1db8   :  { %v2630_v13 = vadd.f32 %v2628_v34, %v2624_v55 }
0x1dba   :  { %3383 = vmatmul.mubr.msk.f32.vlgmr.msra.gmra.mrb[24].mxu1 %vm196_vm5, %v2630_v13 }
0x1dbb   :  { %3412 = vmatprep.mubr.msk.f32.mxu1 %vm3911_vm0, %v3912_v1  ;;  %v2715_v1 = vrot.slane %v4386_v56, %v1376_v30 }
0x1e8d   :  { %v3384_v49 = vpop.f32.mrb[24].mxu1 }
0x1e8e   :  { %v2717_v50 = vadd.f32 %v3384_v49, %v2715_v1  ;;  %v2703_v53 = vpop.f32.mrb[25].mxu1  ;;  %v2864_v49 = vld [vmem:[#allocation5 + $0x190] sm:$0xff] }
0x1e8f   :  { %v2716_v8 = vadd.f32 %v2715_v1, %v2703_v53  ;;  %v3604_v1 = vpack.c.bf16 %v2863_v48, %v2862_v37  ;;  %v2865_v53 = vld [vmem:[#allocation5 + $0x198] sm:$0xff] }
0x1e90   :  { %v2721_v7 = vmul.f32 0.70710677, %v2717_v50  ;;  %v2719_v46 = vmul.f32 0.5, %v2717_v50  ;;  %v2856_v50 = vrot.slane %v4386_v56, %v1519_v38 }
0x1e91   :  { %v2720_v57 = vmul.f32 0.70710677, %v2716_v8  ;;  %v2718_v25 = vmul.f32 0.5, %v2716_v8  ;;  %3605 = vmatpush3.bf16.msra.mxu1 %v3604_v1 }
0x1e92   :  { %v2727_v32 = vand.u32 2147483647, %v2721_v7  ;;  %vm2723_vm0 = vcmp.ge.f32.partialorder %v2721_v7, 0.0  ;;  %3606 = vmatprep.subr.bf16.mxu1 %v3910_v0  ;;  %v2869_v0 = vrot.slane %v4386_v56, %v4023_v54 }
0x1e93   :  { %v2726_v33 = vand.u32 2147483647, %v2720_v57  ;;  %vm2722_vm6 = vcmp.ge.f32.partialorder %v2720_v57, 0.0  ;;  %v2725_v13 = vsel %vm2723_vm0, 1.0, %v3929_v63 }
0x1e94   :  { %v2729_v58 = vmul.f32 0.3275911, %v2727_v32  ;;  %v2755_v6 = vsub.f32 0.0, %v2727_v32  ;;  %v2724_v27 = vsel %vm2722_vm6, 1.0, %v3929_v63  ;;  %v3607_v63 = vpack.c.bf16 %v2865_v53, %v2864_v49 }
0x1e95   :  { %v2728_v62 = vmul.f32 0.3275911, %v2726_v33  ;;  %v2754_v16 = vsub.f32 0.0, %v2726_v33 }
0x1e96   :  { %v2731_v3 = vadd.f32 1.0, %v2729_v58  ;;  %v2757_v26 = vmul.f32 %v2755_v6, %v2727_v32  ;;  %3608 = vmatpush3.bf16.msra.mxu1 %v3607_v63 }
0x1e97   :  { %v2730_v5 = vadd.f32 1.0, %v2728_v62  ;;  %v2756_v23 = vmul.f32 %v2754_v16, %v2726_v33 }
0x1e98   :  { %3803 = vrcp.f32 %v2731_v3  ;;  %v2760_v35 = vmul.f32 1.442695, %v2757_v26 }
0x1e99   :  { %3805 = vrcp.f32 %v2730_v5  ;;  %v2758_v15 = vmul.f32 1.442695, %v2756_v23 }
0x1e9a   :  { %3807 = vpow2.f32 %v2760_v35 }
0x1e9b   :  { %3809 = vpow2.f32 %v2758_v15 }
0x1ea2   :  { %v3804_v2 = vpop.eup %3803 }
0x1ea3   :  { %v3806_v11 = vpop.eup %3805  ;;  %v2737_v30 = vmul.f32 1.0614054, %v3804_v2 }
0x1ea4   :  { %v2736_v44 = vmul.f32 1.0614054, %v3806_v11  ;;  %v3808_v34 = vpop.eup %3807 }
0x1ea5   :  { %v2739_v45 = vadd.f32 -1.4531521, %v2737_v30  ;;  %v3810_v40 = vpop.eup %3809 }
0x1ea6   :  { %v2738_v12 = vadd.f32 -1.4531521, %v2736_v44 }
0x1ea7   :  { %v2741_v14 = vmul.f32 %v3804_v2, %v2739_v45 }
0x1ea8   :  { %v2740_v17 = vmul.f32 %v3806_v11, %v2738_v12 }
0x1ea9   :  { %v2743_v18 = vadd.f32 1.4214138, %v2741_v14 }
0x1eaa   :  { %v2742_v43 = vadd.f32 1.4214138, %v2740_v17 }
0x1eab   :  { %v2745_v9 = vmul.f32 %v3804_v2, %v2743_v18 }
0x1eac   :  { %v2744_v19 = vmul.f32 %v3806_v11, %v2742_v43 }
0x1ead   :  { %v2747_v20 = vadd.f32 -0.28449672, %v2745_v9 }
0x1eae   :  { %v2746_v21 = vadd.f32 -0.28449672, %v2744_v19 }
0x1eaf   :  { %v2749_v22 = vmul.f32 %v3804_v2, %v2747_v20 }
0x1eb0   :  { %v2748_v28 = vmul.f32 %v3806_v11, %v2746_v21 }
0x1eb1   :  { %v2751_v29 = vadd.f32 0.2548296, %v2749_v22 }
0x1eb2   :  { %v2750_v51 = vadd.f32 0.2548296, %v2748_v28 }
0x1eb3   :  { %v2753_v31 = vmul.f32 %v3804_v2, %v2751_v29 }
0x1eb4   :  { %v2752_v36 = vmul.f32 %v3806_v11, %v2750_v51 }
0x1eb5   :  { %v2763_v24 = vmul.f32 %v3808_v34, %v2753_v31 }
0x1eb6   :  { %v2762_v41 = vmul.f32 %v3810_v40, %v2752_v36 }
0x1eb7   :  { %v2765_v55 = vsub.f32 1.0, %v2763_v24 }
0x1eb8   :  { %v2764_v60 = vsub.f32 1.0, %v2762_v41 }
0x1eb9   :  { %v2767_v4 = vmul.f32 %v2765_v55, %v2725_v13 }
0x1eba   :  { %v2766_v42 = vmul.f32 %v2764_v60, %v2724_v27 }
0x1ebb   :  { %v2769_v61 = vadd.f32 1.0, %v2767_v4 }
0x1ebc   :  { %v2768_v39 = vadd.f32 1.0, %v2766_v42 }
0x1ebd   :  { %v2771_v10 = vmul.f32 %v2769_v61, %v2719_v46 }
0x1ebe   :  { %v2770_v47 = vmul.f32 %v2768_v39, %v2718_v25 }
0x1ec0   :  { %3401 = vmatprep.mubr.msk.f32.mxu0 %vm66_vm1, %v2770_v47 }
0x1ec1   :  { %3402 = vmatmul.mubr.msk.f32.vlgmr.msra.gmra.mrb[22].mxu0 %vm66_vm1, %v2771_v10 }
0x1f94   :  { %v3403_v7 = vpop.f32.mrb[22].mxu0 }
0x1f95   :  { %v2844_v8 = vpop.f32.mrb[23].mxu0 }
0x1f96   :  { %v2852_v57 = vadd.f32 %v2844_v8, %v4393_v59 }
0x1f98   :  { %v2857_v32 = vadd.f32 %v2856_v50, %v2852_v57 }
0x1f9a   :  { %v2859_v33 = vrot.slane %v2857_v32, 4 }
0x1f9c   :  { %v2861_v58 = vsel %vm155_vm2, %v2857_v32, %v2859_v33 }
0x1f9d   :  { %3413 = vmatmul.mubr.msk.f32.vlgmr.msra.gmra.mrb[26].mxu1 %vm196_vm5, %v2861_v58 }
0x2070   :  { %v2939_v62 = vpop.f32.mrb[26].mxu1 }
0x2071   :  { %v2940_v3 = vadd.f32 %v2939_v62, %v2869_v0  ;;  %v3414_v5 = vpop.f32.mrb[27].mxu1 }
0x2073   :  { %2943 = vst [vmem:[#allocation8] sm:$0x3] %v2940_v3 }
0x2074   :  { %3888 = shalt.err (!%p3885_p0)
}
0x2075   :  { %s3889_s10 = scalar_lea.hbm %s4443_s3, 32 }
0x2076   :  { %p3890_p1 = scmp.ne.s32.totalorder %s4443_s3, %s3889_s10  ;;  %p3893_p2 = scmp.lt.u32.totalorder %s3889_s10, %s4443_s3 }
0x2078   :  { %p3895_p3 = pnand %p3893_p2, %p3890_p1 }
0x207a   :  { %3898 = shalt.err (!%p3895_p3)
}
0x207b   :  { %2953 = dma.vmem_to_hbm [thread:$0]  %s2951_s7, 32, %s4443_s3, [#allocation4]  }
0x207c   :  { %3903 = dma.done.wait [#allocation4], 32  }
0x207d   :  { %3904 = vsyncadd [#allocation4], 4294967264 }
0x207e   :  { %2957 = vsyncpa [#allocation3], 1 }
0x207f   :  { %2958 = vsyncpa [#allocation6], 1 }
0x2080   :  { %2959 = vsyncpa [#allocation4], 1 }

</bundles_post_ra>
